<compile_context>
chip_gen: v5e
topology: v5e:2x2
jax: 0.10.0
libtpu: 0.0.40
codegen_flags: <defaults>
</compile_context>

<pallas_src>
import math

import jax
import jax.numpy as jnp
from jax.experimental import pallas as pl
from jax.experimental.pallas import tpu as pltpu

# 784 -> 200 x5 -> 1, matching nn.ModuleList([...]) in CLImageDN.__init__
LAYER_DIMS = [(784, 200), (200, 200), (200, 200), (200, 200), (200, 200), (200, 1)]

IN_DIM = 784     # flattened 1x28x28 image; NOT padded (streamed as-is)
HID_DIM = 200
HID_PAD = 256    # hidden padded to a lane multiple (matches 256-wide MXU)


def _round_up(x, m):
    return (x + m - 1) // m * m


def climagedn_kernel(x_ref,
                     w1, b1, w2, b2, w3, b3, w4, b4, w5, b5, w6, b6,
                     o_ref):
    """One batch tile: 5x (bf16 matmul -> f32 accum + bias + ReLU) + f32 reduce."""

    def dense_relu(h_bf16, w_ref, b_ref):
        y = jnp.dot(h_bf16, w_ref[...], preferred_element_type=jnp.float32)
        return jnp.maximum(y + b_ref[...], 0.0)           # f32

    h = dense_relu(x_ref[...], w1, b1)                     # (TB, HID_PAD) f32
    h = dense_relu(h.astype(jnp.bfloat16), w2, b2)
    h = dense_relu(h.astype(jnp.bfloat16), w3, b3)
    h = dense_relu(h.astype(jnp.bfloat16), w4, b4)
    h = dense_relu(h.astype(jnp.bfloat16), w5, b5)
    # Final 256 -> 1 layer as an exact-f32 VPU multiply + XLU lane reduction; an
    # N=1 MXU pass would use <1% of the systolic columns for a full push/drain.
    o_ref[...] = jnp.sum(h * w6[...], axis=-1, keepdims=True) + b6[...]


def prepare_params(params):
    """Pad/cast weights once (outside the kernel).

    Hidden dims 200 -> 256 (lane-aligned, zero pad is numerically exact: padded
    activation lanes stay exactly 0 through bias/ReLU).  The 784 input dim is
    NOT padded.  MXU-layer weights are bf16; biases and the final-layer row
    stay f32 (added after the f32 accumulation).
    """
    (w1, b1), (w2, b2), (w3, b3), (w4, b4), (w5, b5), (w6, b6) = params

    def pad_w(w, rpad, cpad):
        w = jnp.asarray(w, jnp.float32)
        w = jnp.pad(w, ((0, rpad - w.shape[0]), (0, cpad - w.shape[1])))
        return w.astype(jnp.bfloat16)

    def pad_b(b, cpad):
        b = jnp.asarray(b, jnp.float32).reshape(1, -1)
        return jnp.pad(b, ((0, 0), (0, cpad - b.shape[-1])))

    # Final-layer weight kept as an f32 (1, HID_PAD) row for the in-kernel reduction.
    w6_row = jnp.pad(jnp.asarray(w6, jnp.float32).reshape(1, -1),
                     ((0, 0), (0, HID_PAD - HID_DIM)))
    b6_s = jnp.asarray(b6, jnp.float32).reshape(1, 1)

    return [
        pad_w(w1, IN_DIM, HID_PAD),  pad_b(b1, HID_PAD),
        pad_w(w2, HID_PAD, HID_PAD), pad_b(b2, HID_PAD),
        pad_w(w3, HID_PAD, HID_PAD), pad_b(b3, HID_PAD),
        pad_w(w4, HID_PAD, HID_PAD), pad_b(b4, HID_PAD),
        pad_w(w5, HID_PAD, HID_PAD), pad_b(b5, HID_PAD),
        w6_row, b6_s,
    ]


def _choose_batch_tiles(B, tb_cap):
    """Balanced batch tiles, >= 2 grid steps (v7x megacore), multiples of 16."""
    n_tiles = max(2, pl.cdiv(B, tb_cap))
    TB = _round_up(pl.cdiv(B, n_tiles), 16)   # 16: bf16 sublane packing
    n_tiles = max(2, pl.cdiv(B, TB))
    return TB, n_tiles


def climagedn_forward(x, params, *, tb=1024):
    """x: (B, C, H, W) image batch with C*H*W == 784. Returns (B, 1) float32.

    tb: batch-tile cap.  Default 1024 is sized for v7x's 64 MiB VMEM; raise to
    2048 on v6e's 128 MiB for large batches to shave per-grid-step overhead.
    """
    B = x.shape[0]
    # Flatten + bf16 cast in one wrapper pass; no feature-padded copy in HBM.
    x_flat = x.reshape(B, -1).astype(jnp.bfloat16)
    assert x_flat.shape[1] == IN_DIM, "CLImageDN expects 784 flattened features"

    TB, n_tiles = _choose_batch_tiles(B, tb)
    B_pad = TB * n_tiles
    x_pad = jnp.pad(x_flat, ((0, B_pad - B), (0, 0)))     # batch pad only

    flat_params = prepare_params(params)

    # x is tiled along batch; params use constant index_maps -> stay VMEM-resident.
    # TODO(synk): pipeline_mode=pl.Buffered(1) on the weight specs would drop
    # their second (pointless) buffer; skipped since VMEM has ample headroom here.
    in_specs = [pl.BlockSpec((TB, IN_DIM), lambda i: (i, 0))]
    for p in flat_params:
        in_specs.append(pl.BlockSpec(p.shape, lambda i: (0, 0)))

    out = pl.pallas_call(
        climagedn_kernel,
        out_shape=jax.ShapeDtypeStruct((B_pad, 1), jnp.float32),
        grid_spec=pltpu.PrefetchScalarGridSpec(
            num_scalar_prefetch=0,
            grid=(n_tiles,),
            in_specs=in_specs,
            out_specs=pl.BlockSpec((TB, 1), lambda i: (i, 0)),
        ),
        compiler_params=pltpu.CompilerParams(
            dimension_semantics=("parallel",),   # shard batch tiles across TCs (v7x)
            vmem_limit_bytes=48 * 1024 * 1024,   # headroom under v7x's 64 MiB
        ),
    )(x_pad, *flat_params)

    return out[:B]


def init_params(key):
    """Deterministic init mimicking nn.Linear default: U(-1/sqrt(fan_in), +)."""
    params = []
    for (din, dout) in LAYER_DIMS:
        key, kw, kb = jax.random.split(key, 3)
        bound = 1.0 / math.sqrt(din)
        w = jax.random.uniform(kw, (din, dout), jnp.float32, -bound, bound)
        b = jax.random.uniform(kb, (1, dout), jnp.float32, -bound, bound)
        params.append((w, b))
    return params


def reference_forward(x, params):
    """Pure-JAX reference mirroring the kernel's bf16-input / f32-accum numerics."""
    B = x.shape[0]
    h_bf16 = x.reshape(B, -1).astype(jnp.bfloat16)
    h_f32 = None
    for (w, b) in params[:-1]:
        y = jnp.dot(h_bf16, jnp.asarray(w, jnp.bfloat16),
                    preferred_element_type=jnp.float32)
        h_f32 = jnp.maximum(y + jnp.asarray(b, jnp.float32).reshape(1, -1), 0.0)
        h_bf16 = h_f32.astype(jnp.bfloat16)
    w6, b6 = params[-1]
    w6 = jnp.asarray(w6, jnp.float32).reshape(1, -1)
    b6 = jnp.asarray(b6, jnp.float32).reshape(1, 1)
    return jnp.sum(h_f32 * w6, axis=-1, keepdims=True) + b6


if __name__ == "__main__":
    key = jax.random.PRNGKey(0)
    key, kx = jax.random.split(key)

    # MNIST-like input consistent with the 784-feature first layer.
    x = jax.random.normal(kx, (2, 1, 28, 28), dtype=jnp.float32)
    params = init_params(key)

    out = jax.block_until_ready(climagedn_forward(x, params))
    ref = reference_forward(x, params)

    assert out.shape == (2, 1)
    assert jnp.allclose(out, ref, atol=1e-2, rtol=1e-2), (out, ref)

    print("KERNEL_OK")
</pallas_src>

<mosaic_0001>
module attributes {stable_mosaic.version = 11 : i64} {
  func.func @climagedn_kernel(%arg0: i32, %arg1: memref<16x784xbf16, #tpu.memory_space<vmem>>, %arg2: memref<784x256xbf16, #tpu.memory_space<vmem>>, %arg3: memref<1x256xf32, #tpu.memory_space<vmem>>, %arg4: memref<256x256xbf16, #tpu.memory_space<vmem>>, %arg5: memref<1x256xf32, #tpu.memory_space<vmem>>, %arg6: memref<256x256xbf16, #tpu.memory_space<vmem>>, %arg7: memref<1x256xf32, #tpu.memory_space<vmem>>, %arg8: memref<256x256xbf16, #tpu.memory_space<vmem>>, %arg9: memref<1x256xf32, #tpu.memory_space<vmem>>, %arg10: memref<256x256xbf16, #tpu.memory_space<vmem>>, %arg11: memref<1x256xf32, #tpu.memory_space<vmem>>, %arg12: memref<1x256xf32, #tpu.memory_space<vmem>>, %arg13: memref<1x1xf32, #tpu.memory_space<vmem>>, %arg14: memref<16x1xf32, #tpu.memory_space<vmem>>) attributes {dimension_semantics = [#tpu.dimension_semantics<parallel>], iteration_bounds = array<i64: 2>, scalar_prefetch = 0 : i64, scratch_operands = 0 : i64, tpu.core_type = #tpu.core_type<tc>, window_params = [{transform_indices = @transform_0, window_bounds = array<i64: 16, 784>}, {pipeline_mode = #tpu.pipeline_mode<synchronous>, transform_indices = @transform_1, window_bounds = array<i64: 784, 256>}, {pipeline_mode = #tpu.pipeline_mode<synchronous>, transform_indices = @transform_2, window_bounds = array<i64: 1, 256>}, {pipeline_mode = #tpu.pipeline_mode<synchronous>, transform_indices = @transform_3, window_bounds = array<i64: 256, 256>}, {pipeline_mode = #tpu.pipeline_mode<synchronous>, transform_indices = @transform_4, window_bounds = array<i64: 1, 256>}, {pipeline_mode = #tpu.pipeline_mode<synchronous>, transform_indices = @transform_5, window_bounds = array<i64: 256, 256>}, {pipeline_mode = #tpu.pipeline_mode<synchronous>, transform_indices = @transform_6, window_bounds = array<i64: 1, 256>}, {pipeline_mode = #tpu.pipeline_mode<synchronous>, transform_indices = @transform_7, window_bounds = array<i64: 256, 256>}, {pipeline_mode = #tpu.pipeline_mode<synchronous>, transform_indices = @transform_8, window_bounds = array<i64: 1, 256>}, {pipeline_mode = #tpu.pipeline_mode<synchronous>, transform_indices = @transform_9, window_bounds = array<i64: 256, 256>}, {pipeline_mode = #tpu.pipeline_mode<synchronous>, transform_indices = @transform_10, window_bounds = array<i64: 1, 256>}, {pipeline_mode = #tpu.pipeline_mode<synchronous>, transform_indices = @transform_11, window_bounds = array<i64: 1, 256>}, {pipeline_mode = #tpu.pipeline_mode<synchronous>, transform_indices = @transform_12, window_bounds = array<i64: 1, 1>}, {transform_indices = @transform_13, window_bounds = array<i64: 16, 1>}]} {
    %c0 = arith.constant 0 : index
    %c0_0 = arith.constant 0 : index
    %0 = vector.load %arg1[%c0, %c0_0] : memref<16x784xbf16, #tpu.memory_space<vmem>>, vector<16x784xbf16>
    %c0_1 = arith.constant 0 : index
    %c0_2 = arith.constant 0 : index
    %1 = vector.load %arg2[%c0_1, %c0_2] : memref<784x256xbf16, #tpu.memory_space<vmem>>, vector<784x256xbf16>
    %cst = arith.constant dense<0.000000e+00> : vector<16x256xf32>
    %2 = tpu.matmul %0, %1, %cst {dimension_numbers = #tpu.dot_dimension_numbers<[1], [0], [0], [1], [0, 0, 1, 1], [], []>} : vector<16x784xbf16>, vector<784x256xbf16>, vector<16x256xf32> -> vector<16x256xf32>
    %c0_3 = arith.constant 0 : index
    %c0_4 = arith.constant 0 : index
    %3 = vector.load %arg3[%c0_3, %c0_4] : memref<1x256xf32, #tpu.memory_space<vmem>>, vector<1x256xf32>
    %4 = vector.broadcast %3 : vector<1x256xf32> to vector<16x256xf32>
    %5 = arith.addf %2, %4 : vector<16x256xf32>
    %cst_5 = arith.constant 0.000000e+00 : f32
    %6 = vector.broadcast %cst_5 : f32 to vector<16x256xf32>
    %7 = arith.maximumf %5, %6 : vector<16x256xf32>
    %8 = arith.truncf %7 : vector<16x256xf32> to vector<16x256xbf16>
    %c0_6 = arith.constant 0 : index
    %c0_7 = arith.constant 0 : index
    %9 = vector.load %arg4[%c0_6, %c0_7] : memref<256x256xbf16, #tpu.memory_space<vmem>>, vector<256x256xbf16>
    %cst_8 = arith.constant dense<0.000000e+00> : vector<16x256xf32>
    %10 = tpu.matmul %8, %9, %cst_8 {dimension_numbers = #tpu.dot_dimension_numbers<[1], [0], [0], [1], [0, 0, 1, 1], [], []>} : vector<16x256xbf16>, vector<256x256xbf16>, vector<16x256xf32> -> vector<16x256xf32>
    %c0_9 = arith.constant 0 : index
    %c0_10 = arith.constant 0 : index
    %11 = vector.load %arg5[%c0_9, %c0_10] : memref<1x256xf32, #tpu.memory_space<vmem>>, vector<1x256xf32>
    %12 = vector.broadcast %11 : vector<1x256xf32> to vector<16x256xf32>
    %13 = arith.addf %10, %12 : vector<16x256xf32>
    %cst_11 = arith.constant 0.000000e+00 : f32
    %14 = vector.broadcast %cst_11 : f32 to vector<16x256xf32>
    %15 = arith.maximumf %13, %14 : vector<16x256xf32>
    %16 = arith.truncf %15 : vector<16x256xf32> to vector<16x256xbf16>
    %c0_12 = arith.constant 0 : index
    %c0_13 = arith.constant 0 : index
    %17 = vector.load %arg6[%c0_12, %c0_13] : memref<256x256xbf16, #tpu.memory_space<vmem>>, vector<256x256xbf16>
    %cst_14 = arith.constant dense<0.000000e+00> : vector<16x256xf32>
    %18 = tpu.matmul %16, %17, %cst_14 {dimension_numbers = #tpu.dot_dimension_numbers<[1], [0], [0], [1], [0, 0, 1, 1], [], []>} : vector<16x256xbf16>, vector<256x256xbf16>, vector<16x256xf32> -> vector<16x256xf32>
    %c0_15 = arith.constant 0 : index
    %c0_16 = arith.constant 0 : index
    %19 = vector.load %arg7[%c0_15, %c0_16] : memref<1x256xf32, #tpu.memory_space<vmem>>, vector<1x256xf32>
    %20 = vector.broadcast %19 : vector<1x256xf32> to vector<16x256xf32>
    %21 = arith.addf %18, %20 : vector<16x256xf32>
    %cst_17 = arith.constant 0.000000e+00 : f32
    %22 = vector.broadcast %cst_17 : f32 to vector<16x256xf32>
    %23 = arith.maximumf %21, %22 : vector<16x256xf32>
    %24 = arith.truncf %23 : vector<16x256xf32> to vector<16x256xbf16>
    %c0_18 = arith.constant 0 : index
    %c0_19 = arith.constant 0 : index
    %25 = vector.load %arg8[%c0_18, %c0_19] : memref<256x256xbf16, #tpu.memory_space<vmem>>, vector<256x256xbf16>
    %cst_20 = arith.constant dense<0.000000e+00> : vector<16x256xf32>
    %26 = tpu.matmul %24, %25, %cst_20 {dimension_numbers = #tpu.dot_dimension_numbers<[1], [0], [0], [1], [0, 0, 1, 1], [], []>} : vector<16x256xbf16>, vector<256x256xbf16>, vector<16x256xf32> -> vector<16x256xf32>
    %c0_21 = arith.constant 0 : index
    %c0_22 = arith.constant 0 : index
    %27 = vector.load %arg9[%c0_21, %c0_22] : memref<1x256xf32, #tpu.memory_space<vmem>>, vector<1x256xf32>
    %28 = vector.broadcast %27 : vector<1x256xf32> to vector<16x256xf32>
    %29 = arith.addf %26, %28 : vector<16x256xf32>
    %cst_23 = arith.constant 0.000000e+00 : f32
    %30 = vector.broadcast %cst_23 : f32 to vector<16x256xf32>
    %31 = arith.maximumf %29, %30 : vector<16x256xf32>
    %32 = arith.truncf %31 : vector<16x256xf32> to vector<16x256xbf16>
    %c0_24 = arith.constant 0 : index
    %c0_25 = arith.constant 0 : index
    %33 = vector.load %arg10[%c0_24, %c0_25] : memref<256x256xbf16, #tpu.memory_space<vmem>>, vector<256x256xbf16>
    %cst_26 = arith.constant dense<0.000000e+00> : vector<16x256xf32>
    %34 = tpu.matmul %32, %33, %cst_26 {dimension_numbers = #tpu.dot_dimension_numbers<[1], [0], [0], [1], [0, 0, 1, 1], [], []>} : vector<16x256xbf16>, vector<256x256xbf16>, vector<16x256xf32> -> vector<16x256xf32>
    %c0_27 = arith.constant 0 : index
    %c0_28 = arith.constant 0 : index
    %35 = vector.load %arg11[%c0_27, %c0_28] : memref<1x256xf32, #tpu.memory_space<vmem>>, vector<1x256xf32>
    %36 = vector.broadcast %35 : vector<1x256xf32> to vector<16x256xf32>
    %37 = arith.addf %34, %36 : vector<16x256xf32>
    %cst_29 = arith.constant 0.000000e+00 : f32
    %38 = vector.broadcast %cst_29 : f32 to vector<16x256xf32>
    %39 = arith.maximumf %37, %38 : vector<16x256xf32>
    %c0_30 = arith.constant 0 : index
    %c0_31 = arith.constant 0 : index
    %40 = vector.load %arg12[%c0_30, %c0_31] : memref<1x256xf32, #tpu.memory_space<vmem>>, vector<1x256xf32>
    %41 = vector.broadcast %40 : vector<1x256xf32> to vector<16x256xf32>
    %42 = arith.mulf %39, %41 : vector<16x256xf32>
    %cst_32 = arith.constant dense<0.000000e+00> : vector<16xf32>
    %43 = vector.multi_reduction <add>, %42, %cst_32 [1] : vector<16x256xf32> to vector<16xf32>
    %44 = vector.shape_cast %43 : vector<16xf32> to vector<16x1xf32>
    %c0_33 = arith.constant 0 : index
    %c0_34 = arith.constant 0 : index
    %45 = vector.load %arg13[%c0_33, %c0_34] : memref<1x1xf32, #tpu.memory_space<vmem>>, vector<1x1xf32>
    %46 = vector.broadcast %45 : vector<1x1xf32> to vector<16x1xf32>
    %47 = arith.addf %44, %46 : vector<16x1xf32>
    %c0_35 = arith.constant 0 : index
    %c0_36 = arith.constant 0 : index
    %48 = vector.load %arg14[%c0_35, %c0_36] : memref<16x1xf32, #tpu.memory_space<vmem>>, vector<16x1xf32>
    tpu.vector_store %arg14[%c0_35, %c0_36], %47 {strides = array<i32>} : memref<16x1xf32, #tpu.memory_space<vmem>>, vector<16x1xf32>,
    return
  }
  func.func @transform_0(%arg0: i32) -> (i32, i32) {
    %c0_i32 = arith.constant 0 : i32
    %c0_i32_0 = arith.constant 0 : i32
    return %arg0, %c0_i32 : i32, i32
  }
  func.func @transform_1(%arg0: i32) -> (i32, i32) {
    %c0_i32 = arith.constant 0 : i32
    %c0_i32_0 = arith.constant 0 : i32
    %c0_i32_1 = arith.constant 0 : i32
    return %c0_i32, %c0_i32_0 : i32, i32
  }
  func.func @transform_2(%arg0: i32) -> (i32, i32) {
    %c0_i32 = arith.constant 0 : i32
    %c0_i32_0 = arith.constant 0 : i32
    %c0_i32_1 = arith.constant 0 : i32
    return %c0_i32, %c0_i32_0 : i32, i32
  }
  func.func @transform_3(%arg0: i32) -> (i32, i32) {
    %c0_i32 = arith.constant 0 : i32
    %c0_i32_0 = arith.constant 0 : i32
    %c0_i32_1 = arith.constant 0 : i32
    return %c0_i32, %c0_i32_0 : i32, i32
  }
  func.func @transform_4(%arg0: i32) -> (i32, i32) {
    %c0_i32 = arith.constant 0 : i32
    %c0_i32_0 = arith.constant 0 : i32
    %c0_i32_1 = arith.constant 0 : i32
    return %c0_i32, %c0_i32_0 : i32, i32
  }
  func.func @transform_5(%arg0: i32) -> (i32, i32) {
    %c0_i32 = arith.constant 0 : i32
    %c0_i32_0 = arith.constant 0 : i32
    %c0_i32_1 = arith.constant 0 : i32
    return %c0_i32, %c0_i32_0 : i32, i32
  }
  func.func @transform_6(%arg0: i32) -> (i32, i32) {
    %c0_i32 = arith.constant 0 : i32
    %c0_i32_0 = arith.constant 0 : i32
    %c0_i32_1 = arith.constant 0 : i32
    return %c0_i32, %c0_i32_0 : i32, i32
  }
  func.func @transform_7(%arg0: i32) -> (i32, i32) {
    %c0_i32 = arith.constant 0 : i32
    %c0_i32_0 = arith.constant 0 : i32
    %c0_i32_1 = arith.constant 0 : i32
    return %c0_i32, %c0_i32_0 : i32, i32
  }
  func.func @transform_8(%arg0: i32) -> (i32, i32) {
    %c0_i32 = arith.constant 0 : i32
    %c0_i32_0 = arith.constant 0 : i32
    %c0_i32_1 = arith.constant 0 : i32
    return %c0_i32, %c0_i32_0 : i32, i32
  }
  func.func @transform_9(%arg0: i32) -> (i32, i32) {
    %c0_i32 = arith.constant 0 : i32
    %c0_i32_0 = arith.constant 0 : i32
    %c0_i32_1 = arith.constant 0 : i32
    return %c0_i32, %c0_i32_0 : i32, i32
  }
  func.func @transform_10(%arg0: i32) -> (i32, i32) {
    %c0_i32 = arith.constant 0 : i32
    %c0_i32_0 = arith.constant 0 : i32
    %c0_i32_1 = arith.constant 0 : i32
    return %c0_i32, %c0_i32_0 : i32, i32
  }
  func.func @transform_11(%arg0: i32) -> (i32, i32) {
    %c0_i32 = arith.constant 0 : i32
    %c0_i32_0 = arith.constant 0 : i32
    %c0_i32_1 = arith.constant 0 : i32
    return %c0_i32, %c0_i32_0 : i32, i32
  }
  func.func @transform_12(%arg0: i32) -> (i32, i32) {
    %c0_i32 = arith.constant 0 : i32
    %c0_i32_0 = arith.constant 0 : i32
    %c0_i32_1 = arith.constant 0 : i32
    return %c0_i32, %c0_i32_0 : i32, i32
  }
  func.func @transform_13(%arg0: i32) -> (i32, i32) {
    %c0_i32 = arith.constant 0 : i32
    %c0_i32_0 = arith.constant 0 : i32
    return %arg0, %c0_i32 : i32, i32
  }
}

</mosaic_0001>

<bundles_post_ra>
// kernel: tpu_custom_call.1
= control target key start
LH: loop header
LB: loop body
LE: loop exit
PB: predicated region body
PF: predicated region fallthrough
CT: control target
= control target key end

     0   :  { %s4381_s0 = inlined_call_operand.hbm [shape: bf16[32,784], index: 0, kind: input, shape index: {}]   ;;  %s4382_s1 = inlined_call_operand.hbm [shape: bf16[784,256], index: 1, kind: input, shape index: {}]   ;;  %s4383_s2 = inlined_call_operand.vmem [shape: f32[1,256], index: 2, kind: input, shape index: {}]   ;;  %s4384_s3 = inlined_call_operand.hbm [shape: bf16[256,256], index: 3, kind: input, shape index: {}]   ;;  %s4385_s4 = inlined_call_operand.vmem [shape: f32[1,256], index: 4, kind: input, shape index: {}]   ;;  %s4386_s5 = inlined_call_operand.hbm [shape: bf16[256,256], index: 5, kind: input, shape index: {}]   ;;  %s4387_s6 = inlined_call_operand.vmem [shape: f32[1,256], index: 6, kind: input, shape index: {}]   ;;  %s4388_s7 = inlined_call_operand.hbm [shape: bf16[256,256], index: 7, kind: input, shape index: {}]   ;;  %s4389_s8 = inlined_call_operand.vmem [shape: f32[1,256], index: 8, kind: input, shape index: {}]   ;;  %s4390_s9 = inlined_call_operand.hbm [shape: bf16[256,256], index: 9, kind: input, shape index: {}]   ;;  %s4391_s10 = inlined_call_operand.vmem [shape: f32[1,256], index: 10, kind: input, shape index: {}]   ;;  %s4392_s11 = inlined_call_operand.vmem [shape: f32[1,256], index: 11, kind: input, shape index: {}]   ;;  %s4393_s12 = inlined_call_operand.<no memory space> [shape: f32[1,1], index: 12, kind: input, shape index: {}]   ;;  %s4394_s13 = inlined_call_operand.vmem [shape: f32[32,1], index: 13, kind: output, shape index: {}]  }
   0x1   :  { %4396 = sst [smem:[#allocation17_spill]] %s4382_s1  ;;  %v18_v0 = vstv %s4393_s12 }
   0x2   :  { %4397 = sst [smem:[#allocation18_spill]] %s4384_s3  ;;  %19 = vst [vmem:[#allocation2] sm:$0x1] %v18_v0 }
   0x3   :  { %4398 = sst [smem:[#allocation19_spill]] %s4386_s5 }
   0x4   :  { %4399 = sst [smem:[#allocation20_spill]] %s4388_s7 }
   0x5   :  { %4400 = sst [smem:[#allocation21_spill]] %s4394_s13 }
   0x6   :  { %20 = vsyncpa [#allocation4], 0 }
   0x7   :  { %22 = vsyncpa [#allocation4 + $0x1], 0 }
   0x8   :  { %23 = vsyncpa [#allocation6], 0 }
   0x9   :  { %24 = vsyncpa [#allocation9], 0 }
   0xa   :  { %25 = vsyncpa [#allocation12], 0  ;;  %s4170_s27 = smov 0   ;;  %s4172_s28 = smov 0  }
   0xb   :  { %s4174_s29 = smov 0   ;;  %s4176_s30 = smov 0  }
   0xc LB: > { %s4401_s1 = sld [smem:[#allocation17_spill]]  ;;  %s4395_s16 = sadd.s32 4294967295, %s4086_s30   ;;  %s4086_s30 = sphi %s4176_s30, %s4415_s30   ;;  %s4082_s29 = sphi %s4174_s29, %s4414_s29   ;;  %s4078_s28 = sphi %s4172_s28, %s4413_s28   ;;  %s4074_s27 = sphi %s4170_s27, %s4412_s27  }
   0xd   : > { %p2575_p0 = scmp.ge.s32.totalorder %s4086_s30, 1  ;;  %p4197_p1 = scmp.eq.s32.totalorder %s4395_s16, 0 }
   0xe   : > { %p340_p2 = scmp.lt.s32.totalorder %s4086_s30, 3  ;;  %s4088_s19 = smov [#allocation5]  }
   0xf   : > { %s353_s20 = sshll.u32 %s4088_s19, 4  ;;  %s4404_s5 = sld [smem:[#allocation19_spill]]  ;;  %s354_s20 = int_to_ptr.vmem [resolvable:$true] %s353_s20 }
  0x10   : > { %p4202_p3 = pnand %p2575_p0, %p340_p2  ;;  %s4406_s3 = sld [smem:[#allocation18_spill]] }
  0x11   : > { %s4089_s14 = smov [#allocation8]   ;;  %s4090_s16 = smov 128  }
  0x12   : > { %s351_s15 = sshll.u32 %s4401_s1, 4  ;;  %p3787_p4 = pneg %p4202_p3  ;;  %s352_s15 = int_to_ptr.hbm [resolvable:$true] %s351_s15 }
  0x13   : > { %s387_s19 = sshll.u32 %s4089_s14, 4  ;;  %s4091_s1 = smov 8   ;;  %s388_s19 = int_to_ptr.vmem [resolvable:$true] %s387_s19 }
  0x14   : > { %p4213_p5 = pnand %p3787_p4, %p4197_p1  ;;  %s4407_s7 = sld [smem:[#allocation20_spill]] }
  0x15   : > { %s385_s23 = sshll.u32 %s4404_s5, 4  ;;  %s4092_s13 = smov [#allocation7]   ;;  %s386_s23 = int_to_ptr.hbm [resolvable:$true] %s385_s23 }
  0x16   : > { %s368_s12 = sshll.u32 %s4406_s3, 4  ;;  %s370_s25 = sshll.u32 %s4092_s13, 4  ;;  %s369_s12 = int_to_ptr.hbm [resolvable:$true] %s368_s12  ;;  %s371_s25 = int_to_ptr.vmem [resolvable:$true] %s370_s25 }
  0x17   : > { %3790 = dma.hbm_to_vmem [thread:$0]  (!%p4213_p5), %s352_s15, 12544, %s354_s20, [#allocation6], %s4090_s16, %s4090_s16, %s4091_s1  }
  0x18   : > { %3796 = dma.hbm_to_vmem [thread:$0]  (!%p4213_p5), %s386_s23, 4096, %s388_s19, [#allocation9], %s4090_s16, %s4090_s16, %s4091_s1  }
  0x19   : > { %3793 = dma.hbm_to_vmem [thread:$0]  (!%p4213_p5), %s369_s12, 4096, %s371_s25, [#allocation6], %s4090_s16, %s4090_s16, %s4091_s1  }
  0x1a   : > { %s402_s5 = sshll.u32 %s4407_s7, 4  ;;  %s4093_s15 = smov [#allocation10]   ;;  %s403_s5 = int_to_ptr.hbm [resolvable:$true] %s402_s5 }
  0x1b   : > { %s404_s20 = sshll.u32 %s4093_s15, 4  ;;  %s419_s14 = sshll.u32 %s4390_s9, 4  ;;  %s405_s20 = int_to_ptr.vmem [resolvable:$true] %s404_s20  ;;  %s420_s14 = int_to_ptr.hbm [resolvable:$true] %s419_s14 }
  0x1c   : > { %3799 = dma.hbm_to_vmem [thread:$0]  (!%p4213_p5), %s403_s5, 4096, %s405_s20, [#allocation9], %s4090_s16, %s4090_s16, %s4091_s1  }
  0x1d   : > { %s4094_s13 = smov [#allocation11]   ;;  %s4237_s12 = sadd.s32 1, %s4086_s30  }
  0x1e   : > { %s421_s19 = sshll.u32 %s4094_s13, 4  ;;  %s35_s21 = ssub.s32 %s4086_s30, %s4237_s12  ;;  %s422_s19 = int_to_ptr.vmem [resolvable:$true] %s421_s19 }
  0x1f   : > { %3802 = dma.hbm_to_vmem [thread:$0]  (!%p4213_p5), %s420_s14, 4096, %s422_s19, [#allocation12], %s4090_s16, %s4090_s16, %s4091_s1  }
  0x20   : > { %s38_s22 = sadd.s32 1, %s4082_s29  ;;  %p36_p6 = scmp.eq.s32.totalorder %s35_s21, 0 }
  0x21   : > { %p45_p7 = scmp.ne.s32.totalorder %s4082_s29, %s4078_s28  ;;  %p46_p8 = scmp.eq.s32.totalorder %s4086_s30, 0 }
  0x22   : > { %p51_p9 = scmp.ne.s32.totalorder %s4078_s28, %s4074_s27  ;;  %p3812_p12 = scmp.lt.s32.totalorder %s4086_s30, 2 }
  0x23   : > { %s4248_s25 = scalar_select %p36_p6, %s4082_s29, %s38_s22  }
  0x24   : > { %p47_p10 = por %p46_p8, %p45_p7  ;;  %p4252_p11 = por %p4197_p1, %p51_p9 }
  0x25   : > { %s444_s24 = sand.u32 1, %s4082_s29   ;;  %s3763_s16 = smul.u32 56, %s4086_s30 }
  0x26   : > { %s3762_s1 = smul.u32 56, %s444_s24  ;;  %p4259_p13 = pnand %p3812_p12, %p47_p10 }
  0x27   : > { %s454_s27 = scalar_lea.hbm %s4381_s0, %s3763_s16  ;;  %s445_s19 = scalar_lea.sflag [#allocation4], %s444_s24 }
  0x28   : > { %s448_s26 = scalar_lea.vmem [#allocation3], %s3762_s1  ;;  %s455_s13 = sshll.u32 %s454_s27, 4  ;;  %s456_s13 = int_to_ptr.hbm [resolvable:$true] %s455_s13 }
  0x29   : > { %s457_s14 = sshll.u32 %s448_s26, 4  ;;  %s4010_s21 = sshra.s32 %s456_s13, 4  ;;  %s458_s14 = int_to_ptr.vmem [resolvable:$true] %s457_s14  ;;  %s4011_s21 = int_to_ptr.hbm [resolvable:$true] %s4010_s21 }
  0x2a   : > { %s4012_s22 = scalar_lea.hbm %s4011_s21, 56  ;;  %p4014_p2 = pneg %p4259_p13 }
  0x2b   : > { %p4013_p0 = scmp.ne.s32.totalorder %s4011_s21, %s4012_s22  ;;  %s4017_s20 = scalar_lea.hbm %s4381_s0, 112 }
  0x2c   : > { %p4018_p6 = scmp.lt.s32.totalorder %s4011_s21, %s4381_s0  ;;  %p4019_p7 = scmp.lt.s32.totalorder %s4017_s20, %s4012_s22 }
  0x2d   : > { %p4015_p4 = pnand %p4014_p2, %p4013_p0 }
  0x2e   : > { %p4020_p8 = por %p4019_p7, %p4018_p6 }
  0x2f   : > { %p4016_p5 = pneg %p4015_p4 }
  0x31   : > { %p4021_p9 = pnand %p4020_p8, %p4016_p5 }
  0x33   : > { %4024 = shalt.err (!%p4021_p9)
}
  0x34   : > { %s4095_s24 = smov 448   ;;  %s4096_s1 = smov 28  }
  0x35   : > { %3806 = dma.hbm_to_vmem [thread:$0]  (!%p4259_p13), %s456_s13, 896, %s458_s14, %s445_s19, %s4095_s24, %s4095_s24, %s4096_s1  }
  0x36   : > { %469 = sbr.rel (%p4202_p3) target bundleno = 1027 (0x403), region = 72  ;;  %s471_s3 = sand.u32 (!%p4202_p3), 1, %s4078_s28  }
  0x37   : > { %s3764_s7 = smul.u32 (!%p4202_p3), 56, %s471_s3  ;;  %s472_s27 = scalar_lea.sflag (!%p4202_p3), [#allocation4], %s471_s3 }
  0x39   : > { %s4279_s26 = scalar_lea.vmem (!%p4202_p3), [#allocation3], %s3764_s7 }
  0x3b   : > { %4057 = dma.done.wait (%p4252_p11), %s472_s27, 896  }
  0x3c   : > { %4059 = vsyncadd (%p4252_p11), %s472_s27, 4294966400 }
  0x3d   : > { %4061 = dma.done.wait (%p4197_p1), [#allocation6], 16640  }
  0x3e   : > { %4063 = vsyncadd (%p4197_p1), [#allocation6], 4294950656 }
  0x3f   : > { %4065 = dma.done.wait (%p4197_p1), [#allocation9], 8192  }
  0x40   : > { %4067 = vsyncadd (%p4197_p1), [#allocation9], 4294959104 }
  0x41   : > { %4069 = dma.done.wait (%p4197_p1), [#allocation12], 4096  }
  0x42   : > { %4071 = vsyncadd (%p4197_p1), [#allocation12], 4294963200  ;;  %v2679_v1 = vld [vmem:[#allocation5 + $0x70] sm:$0xf]  ;;  %v3551_v2 = vld [vmem:[#allocation5 + $0x74] sm:$0xf0] }
  0x43   : > { %v2807_v3 = vld [vmem:[#allocation5 + $0x170] sm:$0xf]  ;;  %v2680_v4 = vor.u32 %v3551_v2, %v2679_v1  ;;  %v3583_v5 = vld [vmem:[#allocation5 + $0x174] sm:$0xf0]  ;;  %v2671_v12 = vld [vmem:[#allocation5 + $0x60] sm:$0xf] }
  0x44   : > { %v2871_v6 = vld [vmem:[#allocation5 + $0x1f0] sm:$0xf]  ;;  %v3599_v7 = vld [vmem:[#allocation5 + $0x1f4] sm:$0xf0]  ;;  %v2808_v8 = vor.u32 %v3583_v5, %v2807_v3  ;;  %v3549_v14 = vld [vmem:[#allocation5 + $0x64] sm:$0xf0] }
  0x45   : > { %v2872_v9 = vor.u32 %v3599_v7, %v2871_v6  ;;  %v2743_v10 = vld [vmem:[#allocation5 + $0xf0] sm:$0xf]  ;;  %v3567_v11 = vld [vmem:[#allocation5 + $0xf4] sm:$0xf0]  ;;  %1193 = vmatpush.bf16.msra.mxu0 %v2680_v4  ;;  %v2799_v15 = vld [vmem:[#allocation5 + $0x160] sm:$0xf]  ;;  %v2672_v17 = vor.u32 %v3549_v14, %v2671_v12 }
  0x46   : > { %v2744_v13 = vor.u32 %v3567_v11, %v2743_v10  ;;  %v3581_v16 = vld [vmem:[#allocation5 + $0x164] sm:$0xf0]  ;;  %1221 = vmatpush.bf16.msra.mxu2 %v2808_v8  ;;  %v2863_v19 = vld [vmem:[#allocation5 + $0x1e0] sm:$0xf]  ;;  %v2663_v24 = vld [vmem:[#allocation5 + $0x50] sm:$0xf] }
  0x47   : > { %1235 = vmatpush.bf16.msra.mxu3 %v2872_v9  ;;  %v2800_v18 = vor.u32 %v3581_v16, %v2799_v15  ;;  %v3597_v20 = vld [vmem:[#allocation5 + $0x1e4] sm:$0xf0]  ;;  %v2735_v21 = vld [vmem:[#allocation5 + $0xe0] sm:$0xf]  ;;  %v3547_v25 = vld [vmem:[#allocation5 + $0x54] sm:$0xf0] }
  0x48   : > { %1207 = vmatpush.bf16.msra.mxu1 %v2744_v13  ;;  %v2864_v22 = vor.u32 %v3597_v20, %v2863_v19  ;;  %v3565_v23 = vld [vmem:[#allocation5 + $0xe4] sm:$0xf0]  ;;  %v2791_v27 = vld [vmem:[#allocation5 + $0x150] sm:$0xf]  ;;  %v3579_v28 = vld [vmem:[#allocation5 + $0x154] sm:$0xf0]  ;;  %v2664_v30 = vor.u32 %v3547_v25, %v2663_v24 }
  0x49   : > { %v2736_v26 = vor.u32 %v3565_v23, %v2735_v21  ;;  %v2855_v29 = vld [vmem:[#allocation5 + $0x1d0] sm:$0xf]  ;;  %1194 = vmatpush.bf16.msra.mxu0 %v2672_v17  ;;  %v3595_v31 = vld [vmem:[#allocation5 + $0x1d4] sm:$0xf0]  ;;  %v2792_v34 = vor.u32 %v3579_v28, %v2791_v27  ;;  %v2655_v36 = vld [vmem:[#allocation5 + $0x40] sm:$0xf] }
  0x4a   : > { %v2727_v32 = vld [vmem:[#allocation5 + $0xd0] sm:$0xf]  ;;  %v3563_v33 = vld [vmem:[#allocation5 + $0xd4] sm:$0xf0]  ;;  %1222 = vmatpush.bf16.msra.mxu2 %v2800_v18  ;;  %v2856_v35 = vor.u32 %v3595_v31, %v2855_v29  ;;  %v3545_v37 = vld [vmem:[#allocation5 + $0x44] sm:$0xf0] }
  0x4b   : > { %1236 = vmatpush.bf16.msra.mxu3 %v2864_v22  ;;  %v2783_v38 = vld [vmem:[#allocation5 + $0x140] sm:$0xf]  ;;  %v2728_v39 = vor.u32 %v3563_v33, %v2727_v32  ;;  %v3577_v40 = vld [vmem:[#allocation5 + $0x144] sm:$0xf0]  ;;  %v2656_v45 = vor.u32 %v3545_v37, %v2655_v36  ;;  %v2647_v48 = vld [vmem:[#allocation5 + $0x30] sm:$0xf] }
  0x4c   : > { %1208 = vmatpush.bf16.msra.mxu1 %v2736_v26  ;;  %v2847_v41 = vld [vmem:[#allocation5 + $0x1c0] sm:$0xf]  ;;  %v3593_v42 = vld [vmem:[#allocation5 + $0x1c4] sm:$0xf0]  ;;  %v2784_v46 = vor.u32 %v3577_v40, %v2783_v38  ;;  %v3543_v49 = vld [vmem:[#allocation5 + $0x34] sm:$0xf0] }
  0x4d   : > { %v2719_v43 = vld [vmem:[#allocation5 + $0xc0] sm:$0xf]  ;;  %v3561_v44 = vld [vmem:[#allocation5 + $0xc4] sm:$0xf0]  ;;  %1195 = vmatpush.bf16.msra.mxu0 %v2664_v30  ;;  %v2848_v47 = vor.u32 %v3593_v42, %v2847_v41  ;;  %v2775_v50 = vld [vmem:[#allocation5 + $0x130] sm:$0xf]  ;;  %v2648_v57 = vor.u32 %v3543_v49, %v2647_v48 }
  0x4e   : > { %1223 = vmatpush.bf16.msra.mxu2 %v2792_v34  ;;  %v2720_v51 = vor.u32 %v3561_v44, %v2719_v43  ;;  %v3575_v52 = vld [vmem:[#allocation5 + $0x134] sm:$0xf0]  ;;  %v2839_v53 = vld [vmem:[#allocation5 + $0x1b0] sm:$0xf]  ;;  %v2639_v60 = vld [vmem:[#allocation5 + $0x20] sm:$0xf] }
  0x4f   : > { %1237 = vmatpush.bf16.msra.mxu3 %v2856_v35  ;;  %v3591_v54 = vld [vmem:[#allocation5 + $0x1b4] sm:$0xf0]  ;;  %v2711_v55 = vld [vmem:[#allocation5 + $0xb0] sm:$0xf]  ;;  %v2776_v58 = vor.u32 %v3575_v52, %v2775_v50  ;;  %v3541_v61 = vld [vmem:[#allocation5 + $0x24] sm:$0xf0] }
  0x50   : > { %1209 = vmatpush.bf16.msra.mxu1 %v2728_v39  ;;  %v3559_v56 = vld [vmem:[#allocation5 + $0xb4] sm:$0xf0]  ;;  %v2840_v59 = vor.u32 %v3591_v54, %v2839_v53  ;;  %v2767_v62 = vld [vmem:[#allocation5 + $0x120] sm:$0xf]  ;;  %v3573_v0 = vld [vmem:[#allocation5 + $0x124] sm:$0xf0]  ;;  %v2640_v5 = vor.u32 %v3541_v61, %v2639_v60 }
  0x51   : > { %1196 = vmatpush.bf16.msra.mxu0 %v2656_v45  ;;  %v2712_v63 = vor.u32 %v3559_v56, %v2711_v55  ;;  %v2831_v1 = vld [vmem:[#allocation5 + $0x1a0] sm:$0xf]  ;;  %v3589_v2 = vld [vmem:[#allocation5 + $0x1a4] sm:$0xf0]  ;;  %v2631_v6 = vld [vmem:[#allocation5 + $0x10] sm:$0xf]  ;;  %v2768_v7 = vor.u32 %v3573_v0, %v2767_v62 }
  0x52   : > { %1224 = vmatpush.bf16.msra.mxu2 %v2784_v46  ;;  %v2703_v3 = vld [vmem:[#allocation5 + $0xa0] sm:$0xf]  ;;  %v3557_v4 = vld [vmem:[#allocation5 + $0xa4] sm:$0xf0]  ;;  %v2832_v8 = vor.u32 %v3589_v2, %v2831_v1  ;;  %v3539_v9 = vld [vmem:[#allocation5 + $0x14] sm:$0xf0] }
  0x53   : > { %1238 = vmatpush.bf16.msra.mxu3 %v2848_v47  ;;  %v2759_v10 = vld [vmem:[#allocation5 + $0x110] sm:$0xf]  ;;  %v3571_v11 = vld [vmem:[#allocation5 + $0x114] sm:$0xf0]  ;;  %v2704_v12 = vor.u32 %v3557_v4, %v2703_v3  ;;  %v2623_v17 = vld [vmem:[#allocation5] sm:$0xf]  ;;  %v2632_v19 = vor.u32 %v3539_v9, %v2631_v6 }
  0x54   : > { %1210 = vmatpush.bf16.msra.mxu1 %v2720_v51  ;;  %v2823_v13 = vld [vmem:[#allocation5 + $0x190] sm:$0xf]  ;;  %v3587_v14 = vld [vmem:[#allocation5 + $0x194] sm:$0xf0]  ;;  %v3537_v18 = vld [vmem:[#allocation5 + $0x4] sm:$0xf0]  ;;  %v2760_v24 = vor.u32 %v3571_v11, %v2759_v10 }
  0x55   : > { %1197 = vmatpush.bf16.msra.mxu0 %v2648_v57  ;;  %v2695_v15 = vld [vmem:[#allocation5 + $0x90] sm:$0xf]  ;;  %v3555_v16 = vld [vmem:[#allocation5 + $0x94] sm:$0xf0]  ;;  %v2751_v20 = vld [vmem:[#allocation5 + $0x100] sm:$0xf]  ;;  %v2824_v25 = vor.u32 %v3587_v14, %v2823_v13  ;;  %v2624_v36 = vor.u32 %v3537_v18, %v2623_v17 }
  0x56   : > { %1225 = vmatpush.bf16.msra.mxu2 %v2776_v58  ;;  %v3569_v21 = vld [vmem:[#allocation5 + $0x104] sm:$0xf0]  ;;  %v2815_v22 = vld [vmem:[#allocation5 + $0x180] sm:$0xf]  ;;  %v2935_v26 = vld [vmem:[#allocation5 + $0x270] sm:$0xf]  ;;  %v2696_v29 = vor.u32 %v3555_v16, %v2695_v15 }
  0x57   : > { %1239 = vmatpush.bf16.msra.mxu3 %v2840_v59  ;;  %v3585_v23 = vld [vmem:[#allocation5 + $0x184] sm:$0xf0]  ;;  %v3615_v27 = vld [vmem:[#allocation5 + $0x274] sm:$0xf0]  ;;  %v3550_v28 = vld [vmem:[#allocation5 + $0x74] sm:$0xf]  ;;  %v2752_v40 = vor.u32 %v3569_v21, %v2751_v20 }
  0x58   : > { %1211 = vmatpush.bf16.msra.mxu1 %v2712_v63  ;;  %v2681_v30 = vld [vmem:[#allocation5 + $0x78] sm:$0xf0]  ;;  %v2687_v31 = vld [vmem:[#allocation5 + $0x80] sm:$0xf]  ;;  %v3553_v32 = vld [vmem:[#allocation5 + $0x84] sm:$0xf0]  ;;  %v2816_v41 = vor.u32 %v3585_v23, %v2815_v22  ;;  %v2936_v45 = vor.u32 %v3615_v27, %v2935_v26 }
  0x59   : > { %1198 = vmatpush.bf16.msra.mxu0 %v2640_v5  ;;  %v2603_v33 = vld [vmem:[%s4279_s26 + $0x8] sm:$0xf]  ;;  %v3533_v34 = vld [vmem:[%s4279_s26 + $0x20] sm:$0xf0]  ;;  %v3007_v38 = vld [vmem:[#allocation5 + $0x300] sm:$0xf]  ;;  %v2684_v46 = vor.u32 %v3550_v28, %v2681_v30  ;;  %v2688_v50 = vor.u32 %v3553_v32, %v2687_v31 }
  0x5a   : > { %1226 = vmatpush.bf16.msra.mxu2 %v2768_v7  ;;  %v2999_v35 = vld [vmem:[#allocation5 + $0x2f0] sm:$0xf]  ;;  %v3631_v37 = vld [vmem:[#allocation5 + $0x2f4] sm:$0xf0]  ;;  %v3633_v39 = vld [vmem:[#allocation5 + $0x304] sm:$0xf0]  ;;  %v4303_v55 = vor.u32 %v3533_v34, %v2603_v33 }
  0x5b   : > { %1240 = vmatpush.bf16.msra.mxu3 %v2832_v8  ;;  %v3566_v42 = vld [vmem:[#allocation5 + $0xf4] sm:$0xf]  ;;  %v2745_v43 = vld [vmem:[#allocation5 + $0xf8] sm:$0xf0]  ;;  %v2595_v44 = vld [vmem:[%s4279_s26] sm:$0xf]  ;;  %v3008_v51 = vor.u32 %v3633_v39, %v3007_v38  ;;  %v3000_v56 = vor.u32 %v3631_v37, %v2999_v35 }
  0x5c   : > { %1212 = vmatpush.bf16.msra.mxu1 %v2704_v12  ;;  %v3532_v47 = vld [vmem:[%s4279_s26 + $0x18] sm:$0xf0]  ;;  %v3530_v48 = vld [vmem:[%s4279_s26 + $0xc] sm:$0xf]  ;;  %v2605_v49 = vld [vmem:[%s4279_s26 + $0x24] sm:$0xf0]  ;;  %v2748_v60 = vor.u32 %v3566_v42, %v2745_v43 }
  0x5d   : > { %1199 = vmatpush.bf16.msra.mxu0 %v2632_v19  ;;  %v2927_v52 = vld [vmem:[#allocation5 + $0x260] sm:$0xf]  ;;  %v3613_v53 = vld [vmem:[#allocation5 + $0x264] sm:$0xf0]  ;;  %v3548_v54 = vld [vmem:[#allocation5 + $0x64] sm:$0xf]  ;;  %v4307_v61 = vor.u32 %v3532_v47, %v2595_v44  ;;  %v4309_v0 = vor.u32 %v3530_v48, %v2605_v49 }
  0x5e   : > { %1227 = vmatpush.bf16.msra.mxu2 %v2760_v24  ;;  %v2673_v57 = vld [vmem:[#allocation5 + $0x68] sm:$0xf0]  ;;  %v2597_v59 = vld [vmem:[%s4279_s26 + $0x1c] sm:$0xf0]  ;;  %v2991_v62 = vld [vmem:[#allocation5 + $0x2e0] sm:$0xf]  ;;  %v2928_v1 = vor.u32 %v3613_v53, %v2927_v52 }
  0x5f   : > { %1241 = vmatpush.bf16.msra.mxu3 %v2824_v25  ;;  %v3529_v58 = vld [vmem:[%s4279_s26 + $0x4] sm:$0xf]  ;;  %v3629_v63 = vld [vmem:[#allocation5 + $0x2e4] sm:$0xf0]  ;;  %v3564_v2 = vld [vmem:[#allocation5 + $0xe4] sm:$0xf]  ;;  %v2676_v4 = vor.u32 %v3548_v54, %v2673_v57 }
  0x60   : > { %1213 = vmatpush.bf16.msra.mxu1 %v2696_v29  ;;  %v2737_v3 = vld [vmem:[#allocation5 + $0xe8] sm:$0xf0]  ;;  %v4311_v5 = vor.u32 %v3529_v58, %v2597_v59  ;;  %v2919_v6 = vld [vmem:[#allocation5 + $0x250] sm:$0xf]  ;;  %v3611_v7 = vld [vmem:[#allocation5 + $0x254] sm:$0xf0]  ;;  %v2992_v8 = vor.u32 %v3629_v63, %v2991_v62 }
  0x61   : > { %1200 = vmatpush.bf16.msra.mxu0 %v2624_v36  ;;  %v3546_v9 = vld [vmem:[#allocation5 + $0x54] sm:$0xf]  ;;  %v2665_v10 = vld [vmem:[#allocation5 + $0x58] sm:$0xf0]  ;;  %v2740_v11 = vor.u32 %v3564_v2, %v2737_v3  ;;  %v2983_v12 = vld [vmem:[#allocation5 + $0x2d0] sm:$0xf]  ;;  %v2920_v14 = vor.u32 %v3611_v7, %v2919_v6 }
  0x62   : > { %1228 = vmatpush.bf16.msra.mxu2 %v2752_v40  ;;  %v3627_v13 = vld [vmem:[#allocation5 + $0x2d4] sm:$0xf0]  ;;  %v3562_v15 = vld [vmem:[#allocation5 + $0xd4] sm:$0xf]  ;;  %v2729_v16 = vld [vmem:[#allocation5 + $0xd8] sm:$0xf0]  ;;  %v2668_v17 = vor.u32 %v3546_v9, %v2665_v10 }
  0x63   : > { %1242 = vmatpush.bf16.msra.mxu3 %v2816_v41  ;;  %v2911_v18 = vld [vmem:[#allocation5 + $0x240] sm:$0xf]  ;;  %v3609_v19 = vld [vmem:[#allocation5 + $0x244] sm:$0xf0]  ;;  %v2984_v20 = vor.u32 %v3627_v13, %v2983_v12  ;;  %v3544_v21 = vld [vmem:[#allocation5 + $0x44] sm:$0xf]  ;;  %v2732_v23 = vor.u32 %v3562_v15, %v2729_v16 }
  0x64   : > { %1214 = vmatpush.bf16.msra.mxu1 %v2688_v50  ;;  %1201 = vmatmul.bf16.vlgmr.msra.gmra.mxu0 %v4307_v61  ;;  %v2657_v22 = vld [vmem:[#allocation5 + $0x48] sm:$0xf0]  ;;  %v2975_v24 = vld [vmem:[#allocation5 + $0x2c0] sm:$0xf]  ;;  %v3625_v25 = vld [vmem:[#allocation5 + $0x2c4] sm:$0xf0]  ;;  %v2912_v26 = vor.u32 %v3609_v19, %v2911_v18 }
  0x65   : > { %1249 = vmatpush.bf16.msrb.mxu0 %v2936_v45  ;;  %1229 = vmatmul.bf16.vlgmr.msra.gmra.mxu2 %v4303_v55  ;;  %v3560_v27 = vld [vmem:[#allocation5 + $0xc4] sm:$0xf]  ;;  %v2721_v28 = vld [vmem:[#allocation5 + $0xc8] sm:$0xf0]  ;;  %v2660_v29 = vor.u32 %v3544_v21, %v2657_v22  ;;  %v2903_v30 = vld [vmem:[#allocation5 + $0x230] sm:$0xf]  ;;  %v2976_v32 = vor.u32 %v3625_v25, %v2975_v24 }
  0x66   : > { %1284 = vmatpush.bf16.msrb.mxu2 %v3008_v51  ;;  %1243 = vmatmul.bf16.vlgmr.msra.gmra.mxu3 %v4309_v0  ;;  %v3607_v31 = vld [vmem:[#allocation5 + $0x234] sm:$0xf0]  ;;  %v3542_v33 = vld [vmem:[#allocation5 + $0x34] sm:$0xf]  ;;  %v2649_v34 = vld [vmem:[#allocation5 + $0x38] sm:$0xf0]  ;;  %v2724_v36 = vor.u32 %v3560_v27, %v2721_v28 }
  0x67   : > { %1291 = vmatpush.bf16.msrb.mxu3 %v2684_v46  ;;  %1215 = vmatmul.bf16.vlgmr.msra.gmra.mxu1 %v4311_v5  ;;  %v2967_v35 = vld [vmem:[#allocation5 + $0x2b0] sm:$0xf]  ;;  %v3623_v37 = vld [vmem:[#allocation5 + $0x2b4] sm:$0xf0]  ;;  %v2619_v38 = vld [vmem:[%s4279_s26 + $0x18] sm:$0xf]  ;;  %v2904_v40 = vor.u32 %v3607_v31, %v2903_v30  ;;  %v2652_v43 = vor.u32 %v3542_v33, %v2649_v34 }
  0x68   : > { %1263 = vmatpush.bf16.msrb.mxu1 %v3000_v56  ;;  %v3535_v39 = vld [vmem:[%s4279_s26 + $0x30] sm:$0xf0]  ;;  %v3558_v41 = vld [vmem:[#allocation5 + $0xb4] sm:$0xf]  ;;  %v2895_v44 = vld [vmem:[#allocation5 + $0x220] sm:$0xf]  ;;  %v2968_v46 = vor.u32 %v3623_v37, %v2967_v35 }
  0x69   : > { %1250 = vmatpush.bf16.msrb.mxu0 %v2928_v1  ;;  %v2713_v42 = vld [vmem:[#allocation5 + $0xb8] sm:$0xf0]  ;;  %v3605_v45 = vld [vmem:[#allocation5 + $0x224] sm:$0xf0]  ;;  %v3540_v47 = vld [vmem:[#allocation5 + $0x24] sm:$0xf]  ;;  %v4319_v49 = vor.u32 %v3535_v39, %v2619_v38 }
  0x6a   : > { %1305 = vmatpush.bf16.msra.mxu2 %v2748_v60  ;;  %v2641_v48 = vld [vmem:[#allocation5 + $0x28] sm:$0xf0]  ;;  %v2716_v50 = vor.u32 %v3558_v41, %v2713_v42  ;;  %v2959_v51 = vld [vmem:[#allocation5 + $0x2a0] sm:$0xf]  ;;  %v3621_v52 = vld [vmem:[#allocation5 + $0x2a4] sm:$0xf0]  ;;  %v2896_v53 = vor.u32 %v3605_v45, %v2895_v44 }
  0x6b   : > { %1292 = vmatpush.bf16.msrb.mxu3 %v2676_v4  ;;  %vm1189_vm0 = vcmask 130048   ;;  %v3556_v54 = vld [vmem:[#allocation5 + $0xa4] sm:$0xf]  ;;  %v2705_v56 = vld [vmem:[#allocation5 + $0xa8] sm:$0xf0]  ;;  %v2644_v57 = vor.u32 %v3540_v47, %v2641_v48  ;;  %v2960_v62 = vor.u32 %v3621_v52, %v2959_v51  ;;  %s4410_s24 = sadd.s32 4294967295, %s4086_s30  }
  0x6c   : > { %1264 = vmatpush.bf16.msrb.mxu1 %v2992_v8  ;;  %v2887_v58 = vld [vmem:[#allocation5 + $0x210] sm:$0xf]  ;;  %v3603_v59 = vld [vmem:[#allocation5 + $0x214] sm:$0xf0]  ;;  %v3538_v60 = vld [vmem:[#allocation5 + $0x14] sm:$0xf]  ;;  %v2708_v3 = vor.u32 %v3556_v54, %v2705_v56 }
  0x6d   : > { %1251 = vmatpush.bf16.msrb.mxu0 %v2920_v14  ;;  %v2633_v63 = vld [vmem:[#allocation5 + $0x18] sm:$0xf0]  ;;  %v2951_v1 = vld [vmem:[#allocation5 + $0x290] sm:$0xf]  ;;  %v3619_v2 = vld [vmem:[#allocation5 + $0x294] sm:$0xf0]  ;;  %v2888_v8 = vor.u32 %v3603_v59, %v2887_v58 }
  0x6e   : > { %1306 = vmatpush.bf16.msra.mxu2 %v2740_v11  ;;  %v3554_v4 = vld [vmem:[#allocation5 + $0x94] sm:$0xf]  ;;  %v2697_v6 = vld [vmem:[#allocation5 + $0x98] sm:$0xf0]  ;;  %v2879_v7 = vld [vmem:[#allocation5 + $0x200] sm:$0xf]  ;;  %v2636_v12 = vor.u32 %v3538_v60, %v2633_v63  ;;  %v2952_v16 = vor.u32 %v3619_v2, %v2951_v1 }
  0x6f   : > { %1293 = vmatpush.bf16.msrb.mxu3 %v2668_v17  ;;  %v3601_v9 = vld [vmem:[#allocation5 + $0x204] sm:$0xf0]  ;;  %v3536_v10 = vld [vmem:[#allocation5 + $0x4] sm:$0xf]  ;;  %v2625_v11 = vld [vmem:[#allocation5 + $0x8] sm:$0xf0] }
  0x70   : > { %1265 = vmatpush.bf16.msrb.mxu1 %v2984_v20  ;;  %v3582_v13 = vld [vmem:[#allocation5 + $0x174] sm:$0xf]  ;;  %v2809_v14 = vld [vmem:[#allocation5 + $0x178] sm:$0xf0]  ;;  %v2943_v18 = vld [vmem:[#allocation5 + $0x280] sm:$0xf]  ;;  %v2700_v20 = vor.u32 %v3554_v4, %v2697_v6  ;;  %v2880_v24 = vor.u32 %v3601_v9, %v2879_v7  ;;  %v2628_v28 = vor.u32 %v3536_v10, %v2625_v11 }
  0x71   : > { %1252 = vmatpush.bf16.msrb.mxu0 %v2912_v26  ;;  %v3614_v15 = vld [vmem:[#allocation5 + $0x274] sm:$0xf]  ;;  %v2937_v17 = vld [vmem:[#allocation5 + $0x278] sm:$0xf0]  ;;  %v3617_v19 = vld [vmem:[#allocation5 + $0x284] sm:$0xf0] }
  0x72   : > { %1307 = vmatpush.bf16.msra.mxu2 %v2732_v23  ;;  %v2611_v21 = vld [vmem:[%s4279_s26 + $0x10] sm:$0xf]  ;;  %v3534_v22 = vld [vmem:[%s4279_s26 + $0x28] sm:$0xf0]  ;;  %v3552_v23 = vld [vmem:[#allocation5 + $0x84] sm:$0xf]  ;;  %v2940_v33 = vor.u32 %v3614_v15, %v2937_v17  ;;  %v2944_v34 = vor.u32 %v3617_v19, %v2943_v18 }
  0x73   : > { %1294 = vmatpush.bf16.msrb.mxu3 %v2660_v29  ;;  %v2689_v25 = vld [vmem:[#allocation5 + $0x88] sm:$0xf0]  ;;  %v3598_v26 = vld [vmem:[#allocation5 + $0x1f4] sm:$0xf]  ;;  %v2873_v27 = vld [vmem:[#allocation5 + $0x1f8] sm:$0xf0]  ;;  %v2812_v29 = vor.u32 %v3582_v13, %v2809_v14  ;;  %v4327_v38 = vor.u32 %v3534_v22, %v2611_v21 }
  0x74   : > { %1266 = vmatpush.bf16.msrb.mxu1 %v2976_v32  ;;  %v3630_v30 = vld [vmem:[#allocation5 + $0x2f4] sm:$0xf]  ;;  %v3001_v31 = vld [vmem:[#allocation5 + $0x2f8] sm:$0xf0]  ;;  %v2613_v35 = vld [vmem:[%s4279_s26 + $0x2c] sm:$0xf0]  ;;  %v2692_v39 = vor.u32 %v3552_v23, %v2689_v25  ;;  %v2876_v42 = vor.u32 %v3598_v26, %v2873_v27 }
  0x75   : > { %1253 = vmatpush.bf16.msrb.mxu0 %v2904_v40  ;;  %3013 = vmatmul.msk.bf16.vlgmr.msrb.gmra.mxu2 %vm1189_vm0, %v4319_v49  ;;  %v3531_v32 = vld [vmem:[%s4279_s26 + $0x14] sm:$0xf]  ;;  %v2801_v37 = vld [vmem:[#allocation5 + $0x168] sm:$0xf0]  ;;  %v3578_v52 = vld [vmem:[#allocation5 + $0x154] sm:$0xf] }
  0x76   : > { %1308 = vmatpush.bf16.msra.mxu2 %v2724_v36  ;;  %v3580_v36 = vld [vmem:[#allocation5 + $0x164] sm:$0xf]  ;;  %v2929_v41 = vld [vmem:[#allocation5 + $0x268] sm:$0xf0]  ;;  %v4329_v45 = vor.u32 %v3531_v32, %v2613_v35  ;;  %v3610_v54 = vld [vmem:[#allocation5 + $0x254] sm:$0xf] }
  0x77   : > { %1295 = vmatpush.bf16.msrb.mxu3 %v2652_v43  ;;  %v3612_v40 = vld [vmem:[#allocation5 + $0x264] sm:$0xf]  ;;  %v3004_v43 = vor.u32 %v3630_v30, %v3001_v31  ;;  %v2865_v47 = vld [vmem:[#allocation5 + $0x1e8] sm:$0xf0]  ;;  %v2921_v56 = vld [vmem:[#allocation5 + $0x258] sm:$0xf0] }
  0x78   : > { %1267 = vmatpush.bf16.msrb.mxu1 %v2968_v46  ;;  %v3596_v44 = vld [vmem:[#allocation5 + $0x1e4] sm:$0xf]  ;;  %v2804_v46 = vor.u32 %v3580_v36, %v2801_v37  ;;  %v2932_v51 = vor.u32 %v3612_v40, %v2929_v41  ;;  %v3594_v59 = vld [vmem:[#allocation5 + $0x1d4] sm:$0xf]  ;;  %v2985_v1 = vld [vmem:[#allocation5 + $0x2d8] sm:$0xf0]  ;;  %v2924_v2 = vor.u32 %v3610_v54, %v2921_v56 }
  0x79   : > { %1254 = vmatpush.bf16.msrb.mxu0 %v2896_v53  ;;  %v3628_v48 = vld [vmem:[#allocation5 + $0x2e4] sm:$0xf]  ;;  %v2793_v53 = vld [vmem:[#allocation5 + $0x158] sm:$0xf0]  ;;  %v3626_v63 = vld [vmem:[#allocation5 + $0x2d4] sm:$0xf] }
  0x7a   : > { %1309 = vmatpush.bf16.msra.mxu2 %v2716_v50  ;;  %v2993_v50 = vld [vmem:[#allocation5 + $0x2e8] sm:$0xf0]  ;;  %v2796_v60 = vor.u32 %v3578_v52, %v2793_v53  ;;  %v3608_v6 = vld [vmem:[#allocation5 + $0x244] sm:$0xf]  ;;  %v2988_v9 = vor.u32 %v3626_v63, %v2985_v1  ;;  %v2777_v17 = vld [vmem:[#allocation5 + $0x138] sm:$0xf0] }
  0x7b   : > { %1296 = vmatpush.bf16.msrb.mxu3 %v2644_v57  ;;  %v2868_v57 = vor.u32 %v3596_v44, %v2865_v47  ;;  %v2996_v58 = vor.u32 %v3628_v48, %v2993_v50  ;;  %v2785_v4 = vld [vmem:[#allocation5 + $0x148] sm:$0xf0]  ;;  %v3592_v10 = vld [vmem:[#allocation5 + $0x1c4] sm:$0xf]  ;;  %v3606_v18 = vld [vmem:[#allocation5 + $0x234] sm:$0xf] }
  0x7c   : > { %1268 = vmatpush.bf16.msrb.mxu1 %v2960_v62  ;;  %v2857_v62 = vld [vmem:[#allocation5 + $0x1d8] sm:$0xf0]  ;;  %v2913_v7 = vld [vmem:[#allocation5 + $0x248] sm:$0xf0]  ;;  %v3624_v13 = vld [vmem:[#allocation5 + $0x2c4] sm:$0xf] }
  0x7d   : > { %1255 = vmatpush.bf16.msrb.mxu0 %v2888_v8  ;;  %v2860_v8 = vor.u32 %v3594_v59, %v2857_v62  ;;  %v2849_v11 = vld [vmem:[#allocation5 + $0x1c8] sm:$0xf0]  ;;  %v2916_v15 = vor.u32 %v3608_v6, %v2913_v7  ;;  %v2841_v22 = vld [vmem:[#allocation5 + $0x1b8] sm:$0xf0]  ;;  %v3622_v23 = vld [vmem:[#allocation5 + $0x2b4] sm:$0xf] }
  0x7e   : > { %1310 = vmatpush.bf16.msra.mxu2 %v2708_v3  ;;  %v3576_v3 = vld [vmem:[#allocation5 + $0x144] sm:$0xf]  ;;  %v2977_v14 = vld [vmem:[#allocation5 + $0x2c8] sm:$0xf0]  ;;  %v2852_v19 = vor.u32 %v3592_v10, %v2849_v11  ;;  %v2761_v40 = vld [vmem:[#allocation5 + $0x118] sm:$0xf0] }
  0x7f   : > { %1297 = vmatpush.bf16.msrb.mxu3 %v2636_v12  ;;  %v2788_v12 = vor.u32 %v3576_v3, %v2785_v4  ;;  %v3572_v26 = vld [vmem:[#allocation5 + $0x124] sm:$0xf]  ;;  %v2769_v27 = vld [vmem:[#allocation5 + $0x128] sm:$0xf0]  ;;  %v3602_v41 = vld [vmem:[#allocation5 + $0x214] sm:$0xf] }
  0x80   : > { %1269 = vmatpush.bf16.msrb.mxu1 %v2952_v16  ;;  %v3574_v16 = vld [vmem:[#allocation5 + $0x134] sm:$0xf]  ;;  %v3588_v32 = vld [vmem:[#allocation5 + $0x1a4] sm:$0xf]  ;;  %v2961_v36 = vld [vmem:[#allocation5 + $0x2a8] sm:$0xf0] }
  0x81   : > { %1256 = vmatpush.bf16.msrb.mxu0 %v2880_v24  ;;  %v2780_v21 = vor.u32 %v3574_v16, %v2777_v17  ;;  %v2969_v24 = vld [vmem:[#allocation5 + $0x2b8] sm:$0xf0]  ;;  %v3620_v35 = vld [vmem:[#allocation5 + $0x2a4] sm:$0xf]  ;;  %v3618_v50 = vld [vmem:[#allocation5 + $0x294] sm:$0xf] }
  0x82   : > { %1311 = vmatpush.bf16.msra.mxu2 %v2700_v20  ;;  %v3590_v20 = vld [vmem:[#allocation5 + $0x1b4] sm:$0xf]  ;;  %v2972_v31 = vor.u32 %v3622_v23, %v2969_v24  ;;  %v2964_v44 = vor.u32 %v3620_v35, %v2961_v36  ;;  %v2825_v48 = vld [vmem:[#allocation5 + $0x198] sm:$0xf0]  ;;  %v3568_v53 = vld [vmem:[#allocation5 + $0x104] sm:$0xf] }
  0x83   : > { %1298 = vmatpush.bf16.msrb.mxu3 %v2628_v28  ;;  %v3604_v28 = vld [vmem:[#allocation5 + $0x224] sm:$0xf]  ;;  %v2844_v30 = vor.u32 %v3590_v20, %v2841_v22  ;;  %v2753_v54 = vld [vmem:[#allocation5 + $0x108] sm:$0xf0]  ;;  %v3073_v10 = vld [vmem:[#allocation7 + $0x70] sm:$0xf] }
  0x84   : > { %1270 = vmatpush.bf16.msrb.mxu1 %v2944_v34  ;;  %1257 = vmatmul.bf16.vlgmr.msrb.gmra.mxu0 %v4327_v38  ;;  %v2833_v34 = vld [vmem:[#allocation5 + $0x1a8] sm:$0xf0]  ;;  %v3600_v56 = vld [vmem:[#allocation5 + $0x204] sm:$0xf]  ;;  %v2756_v63 = vor.u32 %v3568_v53, %v2753_v54  ;;  %v3649_v11 = vld [vmem:[#allocation7 + $0x74] sm:$0xf0] }
  0x85   : > { %1319 = vmatpush.bf16.msra.mxu0 %v2812_v29  ;;  %v2897_v29 = vld [vmem:[#allocation5 + $0x228] sm:$0xf0]  ;;  %v3584_v1 = vld [vmem:[#allocation5 + $0x184] sm:$0xf]  ;;  %v3065_v16 = vld [vmem:[#allocation7 + $0x60] sm:$0xf] }
  0x86   : > { %1312 = vmatpush.bf16.msra.mxu2 %v2692_v39  ;;  %1299 = vmatmul.bf16.vlgmr.msrb.gmra.mxu3 %v4307_v61  ;;  %v2980_v61 = vor.u32 %v3624_v13, %v2977_v14  ;;  %v2900_v37 = vor.u32 %v3604_v28, %v2897_v29  ;;  %v3570_v39 = vld [vmem:[#allocation5 + $0x114] sm:$0xf]  ;;  %v3009_v59 = vld [vmem:[#allocation5 + $0x308] sm:$0xf0]  ;;  %v3616_v4 = vld [vmem:[#allocation5 + $0x284] sm:$0xf]  ;;  %v3074_v13 = vor.u32 %v3649_v11, %v3073_v10 }
  0x87   : > { %1347 = vmatpush.bf16.msra.mxu3 %v2940_v33  ;;  %1271 = vmatmul.bf16.vlgmr.msrb.gmra.mxu1 %v4329_v45  ;;  %v2772_v33 = vor.u32 %v3572_v26, %v2769_v27  ;;  %v2764_v47 = vor.u32 %v3570_v39, %v2761_v40  ;;  %v2945_v6 = vld [vmem:[#allocation5 + $0x288] sm:$0xf0]  ;;  %v3647_v17 = vld [vmem:[#allocation7 + $0x64] sm:$0xf0]  ;;  %v3642_v23 = vld [vmem:[#allocation7 + $0x44] sm:$0xf] }
  0x88   : > { %1333 = vmatpush.bf16.msra.mxu1 %v2876_v42  ;;  %v2889_v42 = vld [vmem:[#allocation5 + $0x218] sm:$0xf0]  ;;  %v3075_v14 = vld [vmem:[#allocation7 + $0x78] sm:$0xf0]  ;;  %v3643_v22 = vld [vmem:[#allocation7 + $0x44] sm:$0xf0] }
  0x89   : > { %1320 = vmatpush.bf16.msra.mxu0 %v2804_v46  ;;  %1313 = vmatmul.bf16.vlgmr.msra.gmra.mxu2 %v4311_v5  ;;  %v2905_v5 = vld [vmem:[#allocation5 + $0x238] sm:$0xf0]  ;;  %v3586_v46 = vld [vmem:[#allocation5 + $0x194] sm:$0xf]  ;;  %v2892_v52 = vor.u32 %v3602_v41, %v2889_v42  ;;  %v3041_v27 = vld [vmem:[#allocation7 + $0x30] sm:$0xf] }
  0x8a   : > { %1361 = vmatpush.bf16.msrb.mxu2 %v3004_v43  ;;  %v2908_v25 = vor.u32 %v3606_v18, %v2905_v5  ;;  %v2836_v43 = vor.u32 %v3588_v32, %v2833_v34  ;;  %v3646_v18 = vld [vmem:[#allocation7 + $0x64] sm:$0xf]  ;;  %v3641_v28 = vld [vmem:[#allocation7 + $0x34] sm:$0xf0]  ;;  %v3640_v29 = vld [vmem:[#allocation7 + $0x34] sm:$0xf] }
  0x8b   : > { %1348 = vmatpush.bf16.msra.mxu3 %v2932_v51  ;;  %v2953_v51 = vld [vmem:[#allocation5 + $0x298] sm:$0xf0]  ;;  %v3639_v34 = vld [vmem:[#allocation7 + $0x24] sm:$0xf0]  ;;  %v3638_v35 = vld [vmem:[#allocation7 + $0x24] sm:$0xf] }
  0x8c   : > { %1334 = vmatpush.bf16.msra.mxu1 %v2868_v57  ;;  %v2881_v57 = vld [vmem:[#allocation5 + $0x208] sm:$0xf0]  ;;  %v2956_v62 = vor.u32 %v3618_v50, %v2953_v51  ;;  %v3025_v40 = vld [vmem:[#allocation7 + $0x10] sm:$0xf]  ;;  %v3637_v41 = vld [vmem:[#allocation7 + $0x14] sm:$0xf0] }
  0x8d   : > { %1321 = vmatpush.bf16.msra.mxu0 %v2796_v60  ;;  %v2828_v60 = vor.u32 %v3586_v46, %v2825_v48  ;;  %v2884_v3 = vor.u32 %v3600_v56, %v2881_v57  ;;  %v3636_v42 = vld [vmem:[#allocation7 + $0x14] sm:$0xf]  ;;  %v3017_v51 = vld [vmem:[#allocation7] sm:$0xf]  ;;  %v3634_v53 = vld [vmem:[#allocation7 + $0x4] sm:$0xf] }
  0x8e   : > { %1362 = vmatpush.bf16.msrb.mxu2 %v2996_v58  ;;  %v3632_v58 = vld [vmem:[#allocation5 + $0x304] sm:$0xf]  ;;  %v3019_v56 = vld [vmem:[#allocation7 + $0x8] sm:$0xf0]  ;;  %v3139_v10 = vld [vmem:[#allocation7 + $0xf8] sm:$0xf0] }
  0x8f   : > { %1349 = vmatpush.bf16.msra.mxu3 %v2924_v2  ;;  %v2817_v2 = vld [vmem:[#allocation5 + $0x188] sm:$0xf0]  ;;  %v3012_v7 = vor.u32 %v3632_v58, %v3009_v59  ;;  %v3022_v58 = vor.u32 %v3634_v53, %v3019_v56  ;;  %v3097_v53 = vld [vmem:[#allocation7 + $0xa0] sm:$0xf]  ;;  %s2591_s1 = sshll.u32 %s4410_s24, 1  ;;  %s4411_s26 = sld [smem:[#allocation21_spill]] }
  0x90   : > { %1335 = vmatpush.bf16.msra.mxu1 %v2860_v8  ;;  %v2820_v8 = vor.u32 %v3584_v1, %v2817_v2  ;;  %p546_p1 = scmp.lt.s32.totalorder %s2591_s1, 3  ;;  %vm2455_vm1 = vcmask 7168  }
  0x91   : > { %1322 = vmatpush.bf16.msra.mxu0 %v2788_v12  ;;  %v3648_v12 = vld [vmem:[#allocation7 + $0x74] sm:$0xf] }
  0x92   : > { %1363 = vmatpush.bf16.msrb.mxu2 %v2988_v9  ;;  %v2948_v9 = vor.u32 %v3616_v4, %v2945_v6  ;;  %v3137_v6 = vld [vmem:[#allocation7 + $0xf0] sm:$0xf]  ;;  %s4417_s1 = smov (!%p546_p1, %s2591_s1), 3 }
  0x93   : > { %1350 = vmatpush.bf16.msra.mxu3 %v2916_v15  ;;  %v3078_v15 = vor.u32 %v3648_v12, %v3075_v14  ;;  %v3129_v14 = vld [vmem:[#allocation7 + $0xe0] sm:$0xf]  ;;  %s2592_s3 = sshll.u32 %s4417_s1, 3 }
  0x94   : > { %1336 = vmatpush.bf16.msra.mxu1 %v2852_v19  ;;  %v3645_v19 = vld [vmem:[#allocation7 + $0x54] sm:$0xf0] }
  0x95   : > { %1323 = vmatpush.bf16.msra.mxu0 %v2780_v21  ;;  %v3049_v21 = vld [vmem:[#allocation7 + $0x40] sm:$0xf]  ;;  %s549_s17 = scalar_lea.vmem %s4411_s26, %s2592_s3 }
  0x96   : > { %1364 = vmatpush.bf16.msrb.mxu2 %v2980_v61  ;;  %v3059_v61 = vld [vmem:[#allocation7 + $0x58] sm:$0xf0]  ;;  %v3050_v24 = vor.u32 %v3643_v22, %v3049_v21  ;;  %v3660_v21 = vld [vmem:[#allocation7 + $0xd4] sm:$0xf] }
  0x97   : > { %1351 = vmatpush.bf16.msra.mxu3 %v2908_v25  ;;  %v3051_v25 = vld [vmem:[#allocation7 + $0x48] sm:$0xf0] }
  0x98   : > { %1337 = vmatpush.bf16.msra.mxu1 %v2844_v30  ;;  %v3054_v26 = vor.u32 %v3642_v23, %v3051_v25  ;;  %v3042_v30 = vor.u32 %v3641_v28, %v3041_v27  ;;  %v3113_v28 = vld [vmem:[#allocation7 + $0xc0] sm:$0xf] }
  0x99   : > { %1324 = vmatpush.bf16.msra.mxu0 %v2772_v33  ;;  %v3033_v33 = vld [vmem:[#allocation7 + $0x20] sm:$0xf] }
  0x9a   : > { %1365 = vmatpush.bf16.msrb.mxu2 %v2972_v31  ;;  %v3043_v31 = vld [vmem:[#allocation7 + $0x38] sm:$0xf0]  ;;  %v3034_v36 = vor.u32 %v3639_v34, %v3033_v33  ;;  %v3115_v33 = vld [vmem:[#allocation7 + $0xc8] sm:$0xf0] }
  0x9b   : > { %1352 = vmatpush.bf16.msra.mxu3 %v2900_v37  ;;  %v3046_v32 = vor.u32 %v3640_v29, %v3043_v31  ;;  %v3035_v37 = vld [vmem:[#allocation7 + $0x28] sm:$0xf0]  ;;  %v3659_v29 = vld [vmem:[#allocation7 + $0xc4] sm:$0xf0] }
  0x9c   : > { %1338 = vmatpush.bf16.msra.mxu1 %v2836_v43  ;;  %v3038_v39 = vor.u32 %v3638_v35, %v3035_v37  ;;  %v3026_v43 = vor.u32 %v3637_v41, %v3025_v40  ;;  %v3114_v31 = vor.u32 %v3659_v29, %v3113_v28  ;;  %v3105_v41 = vld [vmem:[#allocation7 + $0xb0] sm:$0xf] }
  0x9d   : > { %1325 = vmatpush.bf16.msra.mxu0 %v2764_v47  ;;  %v4344_v47 = vld [vmem:[%s4383_s2] sm:$0x3] }
  0x9e   : > { %1366 = vmatpush.bf16.msrb.mxu2 %v2964_v44  ;;  %v3027_v44 = vld [vmem:[#allocation7 + $0x18] sm:$0xf0]  ;;  %v660_v59 = vperm.slane %v4344_v47, 0 }
  0x9f   : > { %1353 = vmatpush.bf16.msra.mxu3 %v2892_v52  ;;  %v3030_v46 = vor.u32 %v3636_v42, %v3027_v44  ;;  %v3635_v52 = vld [vmem:[#allocation7 + $0x4] sm:$0xf0]  ;;  %v3657_v42 = vld [vmem:[#allocation7 + $0xb4] sm:$0xf0] }
  0xa0   : > { %1339 = vmatpush.bf16.msra.mxu1 %v2828_v60  ;;  %v3018_v54 = vor.u32 %v3635_v52, %v3017_v51  ;;  %v3106_v44 = vor.u32 %v3657_v42, %v3105_v41  ;;  %v3697_v41 = vld [vmem:[#allocation8 + $0xf4] sm:$0xf0]  ;;  %v3680_v42 = vld [vmem:[#allocation8 + $0x74] sm:$0xf] }
  0xa1   : > { %1326 = vmatpush.bf16.msra.mxu0 %v2756_v63 }
  0xa2   : > { %1367 = vmatpush.bf16.msrb.mxu2 %v2956_v62 }
  0xa3   : > { %1354 = vmatpush.bf16.msra.mxu3 %v2884_v3 }
  0xa4   : > { %1340 = vmatpush.bf16.msra.mxu1 %v2820_v8  ;;  %1327 = vmatmul.bf16.vlgmr.msra.gmra.mxu0 %v4303_v55  ;;  %v3066_v55 = vor.u32 %v3647_v17, %v3065_v16  ;;  %v3664_v8 = vld [vmem:[#allocation7 + $0xf4] sm:$0xf]  ;;  %v3662_v16 = vld [vmem:[#allocation7 + $0xe4] sm:$0xf] }
  0xa5   : > { %1382 = vmatpush.bf16.msrb.mxu0 %v3012_v7  ;;  %v3665_v7 = vld [vmem:[#allocation7 + $0xf4] sm:$0xf0]  ;;  %v3142_v12 = vor.u32 %v3664_v8, %v3139_v10  ;;  %v3081_v8 = vld [vmem:[#allocation7 + $0x80] sm:$0xf]  ;;  %v3650_v10 = vld [vmem:[#allocation7 + $0x84] sm:$0xf] }
  0xa6   : > { %1355 = vmatmul.bf16.vlgmr.msra.gmra.mxu3 %v4327_v38  ;;  %1368 = vmatpush.bf16.msrb.mxu2 %v2948_v9  ;;  %v3067_v38 = vld [vmem:[#allocation7 + $0x68] sm:$0xf0]  ;;  %v3138_v9 = vor.u32 %v3665_v7, %v3137_v6 }
  0xa7   : > { %1341 = vmatmul.bf16.vlgmr.msra.gmra.mxu1 %v4309_v0  ;;  %v3070_v5 = vor.u32 %v3646_v18, %v3067_v38  ;;  %v3057_v0 = vld [vmem:[#allocation7 + $0x50] sm:$0xf]  ;;  %v3131_v38 = vld [vmem:[#allocation7 + $0xe8] sm:$0xf0] }
  0xa8   : > { %1593 = vmatpush.bf16.msrb.mxu1 %v3074_v13  ;;  %1607 = vmatpush.bf16.msrb.mxu3 %v3138_v9  ;;  %v3651_v9 = vld [vmem:[#allocation7 + $0x84] sm:$0xf0] }
  0xa9   : > { %1369 = vmatmul.bf16.vlgmr.msrb.gmra.mxu2 %v4329_v45  ;;  %1621 = vmatpush.bf16.msra.mxu0 %v3078_v15  ;;  %v3644_v45 = vld [vmem:[#allocation7 + $0x54] sm:$0xf]  ;;  %v3663_v15 = vld [vmem:[#allocation7 + $0xe4] sm:$0xf0] }
  0xaa   : > { %v3062_v20 = vor.u32 %v3644_v45, %v3059_v61  ;;  %1635 = vmatpush.bf16.msra.mxu2 %v3142_v12  ;;  %v3083_v12 = vld [vmem:[#allocation7 + $0x88] sm:$0xf0] }
  0xac   : > { %1594 = vmatpush.bf16.msrb.mxu1 %v3066_v55  ;;  %v3130_v55 = vor.u32 %v3663_v15, %v3129_v14  ;;  %v661_v14 = vperm.slane %v4344_v47, 1 }
  0xad   : > { %1622 = vmatpush.bf16.msra.mxu0 %v3070_v5 }
  0xae   : > { %1608 = vmatpush.bf16.msrb.mxu3 %v3130_v55 }
  0xb1   : > { %1623 = vmatpush.bf16.msra.mxu0 %v3062_v20  ;;  %v3661_v20 = vld [vmem:[#allocation7 + $0xd4] sm:$0xf0] }
  0xb4   : > { %3014 = vmatmul.msk.bf16.vlgmr.msrb.gmra.mxu0 %vm1189_vm0, %v4319_v49  ;;  %v3058_v49 = vor.u32 %v3645_v19, %v3057_v0  ;;  %v3134_v0 = vor.u32 %v3662_v16, %v3131_v38 }
  0xb5   : > { %1624 = vmatpush.bf16.msra.mxu0 %v3054_v26 }
  0xb6   : > { %1595 = vmatpush.bf16.msrb.mxu1 %v3058_v49  ;;  %1636 = vmatpush.bf16.msra.mxu2 %v3134_v0  ;;  %v3121_v49 = vld [vmem:[#allocation7 + $0xd0] sm:$0xf] }
  0xb7   : > { %v3122_v23 = vor.u32 %v3661_v20, %v3121_v49 }
  0xb9   : > { %1625 = vmatpush.bf16.msra.mxu0 %v3046_v32  ;;  %1609 = vmatpush.bf16.msrb.mxu3 %v3122_v23  ;;  %v3658_v32 = vld [vmem:[#allocation7 + $0xc4] sm:$0xf] }
  0xba   : > { %1596 = vmatpush.bf16.msrb.mxu1 %v3050_v24  ;;  %v3123_v24 = vld [vmem:[#allocation7 + $0xd8] sm:$0xf0]  ;;  %v3118_v35 = vor.u32 %v3658_v32, %v3115_v33 }
  0xbb   : > { %v3126_v25 = vor.u32 %v3660_v21, %v3123_v24 }
  0xbd   : > { %1626 = vmatpush.bf16.msra.mxu0 %v3038_v39  ;;  %1637 = vmatpush.bf16.msra.mxu2 %v3126_v25 }
  0xbe   : > { %1597 = vmatpush.bf16.msrb.mxu1 %v3042_v30  ;;  %1610 = vmatpush.bf16.msrb.mxu3 %v3114_v31 }
  0xc1   : > { %1627 = vmatpush.bf16.msra.mxu0 %v3030_v46  ;;  %1638 = vmatpush.bf16.msra.mxu2 %v3118_v35  ;;  %v3107_v46 = vld [vmem:[#allocation7 + $0xb8] sm:$0xf0] }
  0xc2   : > { %1598 = vmatpush.bf16.msrb.mxu1 %v3034_v36  ;;  %1611 = vmatpush.bf16.msrb.mxu3 %v3106_v44 }
  0xc5   : > { %1628 = vmatpush.bf16.msra.mxu0 %v3022_v58  ;;  %v3099_v58 = vld [vmem:[#allocation7 + $0xa8] sm:$0xf0] }
  0xc6   : > { %1599 = vmatpush.bf16.msrb.mxu1 %v3026_v43  ;;  %v3656_v43 = vld [vmem:[#allocation7 + $0xb4] sm:$0xf] }
  0xca   : > { %1600 = vmatpush.bf16.msrb.mxu1 %v3018_v54  ;;  %v3655_v54 = vld [vmem:[#allocation7 + $0xa4] sm:$0xf0] }
  0xcb   : > { %v3098_v56 = vor.u32 %v3655_v54, %v3097_v53  ;;  %v3679_v53 = vld [vmem:[#allocation8 + $0x64] sm:$0xf0]  ;;  %v3257_v54 = vld [vmem:[#allocation8 + $0xe0] sm:$0xf] }
  0xcd   : > { %1612 = vmatpush.bf16.msrb.mxu3 %v3098_v56  ;;  %v3695_v56 = vld [vmem:[#allocation8 + $0xe4] sm:$0xf0] }
  0xe1   : > { %v1202_v48 = vpop.f32.mrf.mxu0 }
  0xe2   : > { %v1203_v60 = vadd.f32 %v1202_v48, %v660_v59 }
  0xe4   : > { %v1216_v57 = vpop.f32.mrf.mxu1 }
  0xe5   : > { %v1217_v1 = vadd.f32 %v1216_v57, %v1203_v60  ;;  %v3654_v57 = vld [vmem:[#allocation7 + $0xa4] sm:$0xf] }
  0xe6   : > { %v3102_v60 = vor.u32 %v3654_v57, %v3099_v58  ;;  %v3258_v58 = vor.u32 %v3695_v56, %v3257_v54  ;;  %v3155_v54 = vld [vmem:[#allocation8 + $0x18] sm:$0xf0] }
  0xe8   : > { %v1230_v50 = vpop.f32.mrf.mxu2 }
  0xe9   : > { %v1204_v62 = vpop.f32.mrf.mxu0  ;;  %v1244_v2 = vpop.f32.mrf.mxu3  ;;  %v1231_v11 = vadd.f32 %v1230_v50, %v1217_v1  ;;  %v3110_v50 = vor.u32 %v3656_v43, %v3107_v46  ;;  %v3653_v1 = vld [vmem:[#allocation7 + $0x94] sm:$0xf0]  ;;  %v3203_v43 = vld [vmem:[#allocation8 + $0x78] sm:$0xf0] }
  0xea   : > { %v1205_v4 = vadd.f32 %v1204_v62, %v660_v59  ;;  %v3206_v46 = vor.u32 %v3680_v42, %v3203_v43  ;;  %v3686_v42 = vld [vmem:[#allocation8 + $0xa4] sm:$0xf]  ;;  %v3227_v43 = vld [vmem:[#allocation8 + $0xa8] sm:$0xf0] }
  0xeb   : > { %v1245_v5 = vadd.f32 %v1244_v2, %v1231_v11  ;;  %1639 = vmatpush.bf16.msra.mxu2 %v3110_v50  ;;  %v3652_v2 = vld [vmem:[#allocation7 + $0x94] sm:$0xf]  ;;  %v3082_v11 = vor.u32 %v3651_v9, %v3081_v8  ;;  %v3267_v50 = vld [vmem:[#allocation8 + $0xf8] sm:$0xf0] }
  0xec   : > { %v1218_v3 = vpop.f32.mrf.mxu1  ;;  %1881 = vmatpush.bf16.msrb.mxu0 %v3206_v46  ;;  %v3676_v8 = vld [vmem:[#allocation8 + $0x54] sm:$0xf]  ;;  %v3153_v46 = vld [vmem:[#allocation8 + $0x10] sm:$0xf] }
  0xed   : > { %v1219_v13 = vadd.f32 %v1218_v3, %v1205_v4  ;;  %v3091_v4 = vld [vmem:[#allocation7 + $0x98] sm:$0xf0] }
  0xee   : > { %v3094_v7 = vor.u32 %v3652_v2, %v3091_v4  ;;  %v3185_v2 = vld [vmem:[#allocation8 + $0x50] sm:$0xf] }
  0xef   : > { %1640 = vmatpush.bf16.msra.mxu2 %v3102_v60  ;;  %v3195_v60 = vld [vmem:[#allocation8 + $0x68] sm:$0xf0] }
  0xf0   : > { %v1232_v63 = vpop.f32.mrf.mxu2 }
  0xf1   : > { %v1233_v45 = vadd.f32 %v1232_v63, %v1219_v13  ;;  %v1246_v22 = vpop.f32.mrf.mxu3  ;;  %v3089_v63 = vld [vmem:[#allocation7 + $0x90] sm:$0xf]  ;;  %v3086_v13 = vor.u32 %v3650_v10, %v3083_v12  ;;  %v3187_v10 = vld [vmem:[#allocation8 + $0x58] sm:$0xf0] }
  0xf2   : > { %v3090_v3 = vor.u32 %v3653_v1, %v3089_v63  ;;  %v3259_v1 = vld [vmem:[#allocation8 + $0xe8] sm:$0xf0]  ;;  %v3251_v12 = vld [vmem:[#allocation8 + $0xd8] sm:$0xf0] }
  0xf3   : > { %v1247_v26 = vadd.f32 %v1246_v22, %v1233_v45  ;;  %1641 = vmatpush.bf16.msra.mxu2 %v3094_v7  ;;  %v3693_v7 = vld [vmem:[#allocation8 + $0xd4] sm:$0xf0] }
  0xf4   : > { %1613 = vmatpush.bf16.msrb.mxu3 %v3090_v3  ;;  %v3677_v3 = vld [vmem:[#allocation8 + $0x54] sm:$0xf0] }
  0xf5   : > { %v3186_v9 = vor.u32 %v3677_v3, %v3185_v2  ;;  %v3683_v3 = vld [vmem:[#allocation8 + $0x84] sm:$0xf0] }
  0xf7   : > { %1642 = vmatpush.bf16.msra.mxu2 %v3086_v13 }
  0xf8   : > { %v1286_v18 = vpop.f32.mrf.mxu2  ;;  %1614 = vmatpush.bf16.msrb.mxu3 %v3082_v11  ;;  %v3692_v11 = vld [vmem:[#allocation8 + $0xd4] sm:$0xf] }
 0x100   : > { %v1288_v37 = vpop.f32.mrf.mxu2 }
 0x101   : > { %v1258_v17 = vpop.f32.mrf.mxu0 }
 0x102   : > { %v1259_v61 = vadd.f32 %v1258_v17, %v1245_v5 }
 0x104   : > { %v1272_v19 = vpop.f32.mrf.mxu1 }
 0x105   : > { %v1273_v27 = vadd.f32 %v1272_v19, %v1259_v61 }
 0x107   : > { %v1287_v39 = vadd.f32 %v1286_v18, %v1273_v27 }
 0x109   : > { %v1260_v30 = vpop.f32.mrf.mxu0  ;;  %v1389_v51 = vmax.f32 %v1287_v39, 0.0  ;;  %v1300_v62 = vpop.f32.mrf.mxu3  ;;  %v3265_v39 = vld [vmem:[#allocation8 + $0xf0] sm:$0xf] }
 0x10a   : > { %v1261_v34 = vadd.f32 %v1260_v30, %v1247_v26  ;;  %v1301_v18 = vadd.f32 %v1300_v62, %v661_v14  ;;  %v3266_v44 = vor.u32 %v3697_v41, %v3265_v39  ;;  %v3694_v62 = vld [vmem:[#allocation8 + $0xe4] sm:$0xf]  ;;  %v3163_v39 = vld [vmem:[#allocation8 + $0x28] sm:$0xf0] }
 0x10b   : > { %v3262_v4 = vor.u32 %v3694_v62, %v3259_v1  ;;  %v3145_v62 = vld [vmem:[#allocation8] sm:$0xf] }
 0x10c   : > { %v1274_v36 = vpop.f32.mrf.mxu1  ;;  %v1314_v6 = vpop.f32.mrf.mxu2  ;;  %1867 = vmatpush.bf16.msra.mxu3 %v3266_v44  ;;  %v3230_v44 = vor.u32 %v3686_v42, %v3227_v43  ;;  %v3209_v1 = vld [vmem:[#allocation8 + $0x80] sm:$0xf] }
 0x10d   : > { %v1275_v40 = vadd.f32 %v1274_v36, %v1261_v34  ;;  %v1315_v38 = vadd.f32 %v1314_v6, %v1301_v18  ;;  %v3201_v36 = vld [vmem:[#allocation8 + $0x70] sm:$0xf]  ;;  %v3254_v18 = vor.u32 %v3692_v11, %v3251_v12  ;;  %v1427_v43 = vld [vmem:[%s4385_s4] sm:$0x3] }
 0x10e   : > { %v3249_v6 = vld [vmem:[#allocation8 + $0xd0] sm:$0xf] }
 0x10f   : > { %v1289_v48 = vadd.f32 %v1288_v37, %v1275_v40  ;;  %v3681_v37 = vld [vmem:[#allocation8 + $0x74] sm:$0xf0]  ;;  %v3250_v13 = vor.u32 %v3693_v7, %v3249_v6  ;;  %v3147_v6 = vld [vmem:[#allocation8 + $0x8] sm:$0xf0]  ;;  %v3210_v7 = vor.u32 %v3683_v3, %v3209_v1  ;;  %v3329_v12 = vld [vmem:[#allocation10 + $0x70] sm:$0xf] }
 0x110   : > { %v3202_v40 = vor.u32 %v3681_v37, %v3201_v36  ;;  %1868 = vmatpush.bf16.msra.mxu3 %v3258_v58  ;;  %v3687_v36 = vld [vmem:[#allocation8 + $0xa4] sm:$0xf0]  ;;  %v3670_v37 = vld [vmem:[#allocation8 + $0x24] sm:$0xf]  ;;  %v3684_v58 = vld [vmem:[#allocation8 + $0x94] sm:$0xf] }
 0x111   : > { %v1391_v52 = vmax.f32 %v1289_v48, 0.0  ;;  %v1302_v15 = vpop.f32.mrf.mxu3  ;;  %v3696_v48 = vld [vmem:[#allocation8 + $0xf4] sm:$0xf]  ;;  %v3166_v41 = vor.u32 %v3670_v37, %v3163_v39 }
 0x112   : > { %v1303_v5 = vadd.f32 %v1302_v15, %v661_v14  ;;  %1853 = vmatpush.bf16.msra.mxu1 %v3202_v40  ;;  %v3190_v14 = vor.u32 %v3676_v8, %v3187_v10  ;;  %v3177_v15 = vld [vmem:[#allocation8 + $0x40] sm:$0xf]  ;;  %v3211_v10 = vld [vmem:[#allocation8 + $0x88] sm:$0xf0] }
 0x113   : > { %v1393_v59 = vpack.c.bf16 %v1391_v52, %v1389_v51  ;;  %v3193_v51 = vld [vmem:[#allocation8 + $0x60] sm:$0xf]  ;;  %v3270_v52 = vor.u32 %v3696_v48, %v3267_v50  ;;  %v3669_v48 = vld [vmem:[#allocation8 + $0x14] sm:$0xf0]  ;;  %v3217_v50 = vld [vmem:[#allocation8 + $0x90] sm:$0xf] }
 0x114   : > { %v1316_v17 = vpop.f32.mrf.mxu2  ;;  %v3194_v57 = vor.u32 %v3679_v53, %v3193_v51  ;;  %1869 = vmatpush.bf16.msra.mxu3 %v3250_v13  ;;  %v3154_v51 = vor.u32 %v3669_v48, %v3153_v46  ;;  %v3668_v53 = vld [vmem:[#allocation8 + $0x14] sm:$0xf]  ;;  %v3713_v13 = vld [vmem:[#allocation10 + $0x74] sm:$0xf0]  ;;  %v1429_v48 = vperm.slane %v1427_v43, 0 }
 0x115   : > { %1601 = vmatmul.bf16.vlgmr.msrb.gmra.mxu1 %v1393_v59  ;;  %1629 = vmatmul.bf16.vlgmr.msra.gmra.mxu0 %v1393_v59  ;;  %v1317_v61 = vadd.f32 %v1316_v17, %v1303_v5  ;;  %v3678_v59 = vld [vmem:[#allocation8 + $0x64] sm:$0xf]  ;;  %v3241_v17 = vld [vmem:[#allocation8 + $0xc0] sm:$0xf]  ;;  %v3179_v5 = vld [vmem:[#allocation8 + $0x48] sm:$0xf0] }
 0x116   : > { %1895 = vmatpush.bf16.msrb.mxu2 %v3270_v52  ;;  %v3198_v63 = vor.u32 %v3678_v59, %v3195_v60  ;;  %1854 = vmatpush.bf16.msra.mxu1 %v3194_v57  ;;  %v3685_v52 = vld [vmem:[#allocation8 + $0x94] sm:$0xf0]  ;;  %v3158_v57 = vor.u32 %v3668_v53, %v3155_v54  ;;  %v3219_v59 = vld [vmem:[#allocation8 + $0x98] sm:$0xf0] }
 0x117   : > { %v3218_v56 = vor.u32 %v3685_v52, %v3217_v50  ;;  %v3222_v60 = vor.u32 %v3684_v58, %v3219_v59  ;;  %v1430_v50 = vperm.slane %v1427_v43, 1  ;;  %v3700_v43 = vld [vmem:[#allocation10 + $0x14] sm:$0xf] }
 0x118   : > { %1882 = vmatpush.bf16.msrb.mxu0 %v3198_v63  ;;  %v3667_v63 = vld [vmem:[#allocation8 + $0x4] sm:$0xf0] }
 0x119   : > { %v3146_v2 = vor.u32 %v3667_v63, %v3145_v62 }
 0x11a   : > { %1896 = vmatpush.bf16.msrb.mxu2 %v3262_v4  ;;  %1855 = vmatpush.bf16.msra.mxu1 %v3186_v9  ;;  %v3666_v4 = vld [vmem:[#allocation8 + $0x4] sm:$0xf] }
 0x11b   : > { %v3150_v8 = vor.u32 %v3666_v4, %v3147_v6  ;;  %v3682_v9 = vld [vmem:[#allocation8 + $0x84] sm:$0xf] }
 0x11c   : > { %1883 = vmatpush.bf16.msrb.mxu0 %v3190_v14  ;;  %v3214_v11 = vor.u32 %v3682_v9, %v3211_v10  ;;  %v3393_v14 = vld [vmem:[#allocation10 + $0xf0] sm:$0xf]  ;;  %v3305_v9 = vld [vmem:[#allocation10 + $0x40] sm:$0xf]  ;;  %v3707_v10 = vld [vmem:[#allocation10 + $0x44] sm:$0xf0] }
 0x11e   : > { %1897 = vmatpush.bf16.msrb.mxu2 %v3254_v18  ;;  %v3331_v18 = vld [vmem:[#allocation10 + $0x78] sm:$0xf0] }
 0x121   : > { %v1328_v16 = vpop.f32.mrf.mxu0 }
 0x122   : > { %v1329_v49 = vadd.f32 %v1328_v16, %v1315_v38  ;;  %v3675_v16 = vld [vmem:[#allocation8 + $0x44] sm:$0xf0]  ;;  %v3674_v38 = vld [vmem:[#allocation8 + $0x44] sm:$0xf] }
 0x124   : > { %v1342_v55 = vpop.f32.mrf.mxu1 }
 0x125   : > { %v1343_v22 = vadd.f32 %v1342_v55, %v1329_v49  ;;  %v3691_v55 = vld [vmem:[#allocation8 + $0xc4] sm:$0xf0]  ;;  %v3182_v49 = vor.u32 %v3674_v38, %v3179_v5  ;;  %v3728_v5 = vld [vmem:[#allocation10 + $0xf4] sm:$0xf] }
 0x127   : > { %1884 = vmatpush.bf16.msrb.mxu0 %v3182_v49  ;;  %v3385_v49 = vld [vmem:[#allocation10 + $0xe0] sm:$0xf] }
 0x129   : > { %v1356_v0 = vpop.f32.mrf.mxu3  ;;  %v1330_v19 = vpop.f32.mrf.mxu0 }
 0x12a   : > { %v1331_v20 = vadd.f32 %v1330_v19, %v1317_v61  ;;  %v1357_v25 = vadd.f32 %v1356_v0, %v1343_v22  ;;  %v3690_v0 = vld [vmem:[#allocation8 + $0xc4] sm:$0xf]  ;;  %v3243_v19 = vld [vmem:[#allocation8 + $0xc8] sm:$0xf0]  ;;  %v3242_v61 = vor.u32 %v3691_v55, %v3241_v17  ;;  %v3673_v22 = vld [vmem:[#allocation8 + $0x34] sm:$0xf0] }
 0x12b   : > { %v3712_v17 = vld [vmem:[#allocation10 + $0x74] sm:$0xf] }
 0x12c   : > { %v1370_v45 = vpop.f32.mrf.mxu2  ;;  %v1344_v21 = vpop.f32.mrf.mxu1  ;;  %1870 = vmatpush.bf16.msra.mxu3 %v3242_v61  ;;  %v3334_v38 = vor.u32 %v3712_v17, %v3331_v18  ;;  %v3711_v61 = vld [vmem:[#allocation10 + $0x64] sm:$0xf0]  ;;  %v3722_v17 = vld [vmem:[#allocation10 + $0xc4] sm:$0xf]  ;;  %v3371_v18 = vld [vmem:[#allocation10 + $0xc8] sm:$0xf0] }
 0x12d   : > { %v1345_v47 = vadd.f32 %v1344_v21, %v1331_v20  ;;  %v1371_v28 = vadd.f32 %v1370_v45, %v1357_v25  ;;  %v3178_v45 = vor.u32 %v3675_v16, %v3177_v15  ;;  %v3246_v20 = vor.u32 %v3690_v0, %v3243_v19  ;;  %v3169_v21 = vld [vmem:[#allocation8 + $0x30] sm:$0xf]  ;;  %v3689_v25 = vld [vmem:[#allocation8 + $0xb4] sm:$0xf0]  ;;  %v3395_v0 = vld [vmem:[#allocation10 + $0xf8] sm:$0xf0] }
 0x12e   : > { %v3330_v15 = vor.u32 %v3713_v13, %v3329_v12  ;;  %v3729_v16 = vld [vmem:[#allocation10 + $0xf4] sm:$0xf0]  ;;  %v3321_v19 = vld [vmem:[#allocation10 + $0x60] sm:$0xf]  ;;  %v3723_v13 = vld [vmem:[#allocation10 + $0xc4] sm:$0xf0] }
 0x12f   : > { %1856 = vmatpush.bf16.msra.mxu1 %v3178_v45  ;;  %1898 = vmatpush.bf16.msrb.mxu2 %v3246_v20  ;;  %v3394_v55 = vor.u32 %v3729_v16, %v3393_v14  ;;  %v3398_v45 = vor.u32 %v3728_v5, %v3395_v0  ;;  %v3727_v20 = vld [vmem:[#allocation10 + $0xe4] sm:$0xf0]  ;;  %v3369_v12 = vld [vmem:[#allocation10 + $0xc0] sm:$0xf]  ;;  %v3706_v14 = vld [vmem:[#allocation10 + $0x44] sm:$0xf] }
 0x130   : > { %v3307_v16 = vld [vmem:[#allocation10 + $0x48] sm:$0xf0]  ;;  %v3297_v5 = vld [vmem:[#allocation10 + $0x30] sm:$0xf]  ;;  %v3705_v0 = vld [vmem:[#allocation10 + $0x34] sm:$0xf0] }
 0x131   : > { %v1358_v23 = vpop.f32.mrf.mxu3  ;;  %v1384_v24 = vpop.f32.mrf.mxu0 }
 0x132   : > { %v1359_v26 = vadd.f32 %v1358_v23, %v1345_v47  ;;  %v1385_v29 = vadd.f32 %v1384_v24, %v1371_v28  ;;  %v3233_v23 = vld [vmem:[#allocation8 + $0xb0] sm:$0xf]  ;;  %v3170_v24 = vor.u32 %v3673_v22, %v3169_v21  ;;  %v3672_v47 = vld [vmem:[#allocation8 + $0x34] sm:$0xf]  ;;  %v3322_v21 = vor.u32 %v3711_v61, %v3321_v19  ;;  %v3721_v61 = vld [vmem:[#allocation10 + $0xb4] sm:$0xf0] }
 0x133   : > { %v3386_v22 = vor.u32 %v3727_v20, %v3385_v49  ;;  %v3361_v19 = vld [vmem:[#allocation10 + $0xb0] sm:$0xf]  ;;  %v3704_v49 = vld [vmem:[#allocation10 + $0x34] sm:$0xf]  ;;  %v3299_v20 = vld [vmem:[#allocation10 + $0x38] sm:$0xf0] }
 0x134   : > { %v1372_v27 = vpop.f32.mrf.mxu2  ;;  %v1390_v33 = vmax.f32 %v1385_v29, 0.0  ;;  %v3688_v29 = vld [vmem:[#allocation8 + $0xb4] sm:$0xf]  ;;  %1857 = vmatpush.bf16.msra.mxu1 %v3170_v24  ;;  %v3323_v24 = vld [vmem:[#allocation10 + $0x68] sm:$0xf0] }
 0x135   : > { %v1373_v30 = vadd.f32 %v1372_v27, %v1359_v26  ;;  %v3171_v26 = vld [vmem:[#allocation8 + $0x38] sm:$0xf0]  ;;  %v3234_v27 = vor.u32 %v3689_v25, %v3233_v23  ;;  %v3710_v23 = vld [vmem:[#allocation10 + $0x64] sm:$0xf] }
 0x136   : > { %v3174_v28 = vor.u32 %v3672_v47, %v3171_v26  ;;  %v3726_v25 = vld [vmem:[#allocation10 + $0xe4] sm:$0xf]  ;;  %v3326_v47 = vor.u32 %v3710_v23, %v3323_v24  ;;  %v3387_v26 = vld [vmem:[#allocation10 + $0xe8] sm:$0xf0]  ;;  %v3720_v23 = vld [vmem:[#allocation10 + $0xb4] sm:$0xf] }
 0x137   : > { %1871 = vmatpush.bf16.msra.mxu3 %v3234_v27  ;;  %v3313_v27 = vld [vmem:[#allocation10 + $0x50] sm:$0xf]  ;;  %v3363_v24 = vld [vmem:[#allocation10 + $0xb8] sm:$0xf0] }
 0x138   : > { %1885 = vmatpush.bf16.msrb.mxu0 %v3174_v28  ;;  %v3709_v28 = vld [vmem:[#allocation10 + $0x54] sm:$0xf0] }
 0x139   : > { %v1386_v31 = vpop.f32.mrf.mxu0 }
 0x13a   : > { %v1387_v32 = vadd.f32 %v1386_v31, %v1373_v30  ;;  %v3235_v30 = vld [vmem:[#allocation8 + $0xb8] sm:$0xf0] }
 0x13b   : > { %v3238_v31 = vor.u32 %v3688_v29, %v3235_v30  ;;  %v3390_v29 = vor.u32 %v3726_v25, %v3387_v26  ;;  %v3377_v30 = vld [vmem:[#allocation10 + $0xd0] sm:$0xf]  ;;  %v3366_v25 = vor.u32 %v3720_v23, %v3363_v24  ;;  %v3703_v26 = vld [vmem:[#allocation10 + $0x24] sm:$0xf0] }
 0x13c   : > { %v1392_v34 = vmax.f32 %v1387_v32, 0.0  ;;  %v3161_v32 = vld [vmem:[#allocation8 + $0x20] sm:$0xf]  ;;  %1886 = vmatpush.bf16.msrb.mxu0 %v3166_v41  ;;  %v3505_v24 = vld [vmem:[#allocation11 + $0xd0] sm:$0xf] }
 0x13d   : > { %1899 = vmatpush.bf16.msrb.mxu2 %v3238_v31  ;;  %v3725_v31 = vld [vmem:[#allocation10 + $0xd4] sm:$0xf0] }
 0x13e   : > { %v1394_v35 = vpack.c.bf16 %v1392_v34, %v1390_v33  ;;  %v3671_v33 = vld [vmem:[#allocation8 + $0x24] sm:$0xf0]  ;;  %v3225_v34 = vld [vmem:[#allocation8 + $0xa0] sm:$0xf]  ;;  %v3378_v37 = vor.u32 %v3725_v31, %v3377_v30  ;;  %v3702_v30 = vld [vmem:[#allocation10 + $0x24] sm:$0xf] }
 0x13f   : > { %v3226_v40 = vor.u32 %v3687_v36, %v3225_v34  ;;  %v3315_v34 = vld [vmem:[#allocation10 + $0x58] sm:$0xf0]  ;;  %v3291_v31 = vld [vmem:[#allocation10 + $0x28] sm:$0xf0] }
 0x140   : > { %1615 = vmatmul.bf16.vlgmr.msrb.gmra.mxu3 %v1394_v35  ;;  %1643 = vmatmul.bf16.vlgmr.msra.gmra.mxu2 %v1394_v35  ;;  %v3162_v35 = vor.u32 %v3671_v33, %v3161_v32  ;;  %v3708_v32 = vld [vmem:[#allocation10 + $0x54] sm:$0xf]  ;;  %v3314_v33 = vor.u32 %v3709_v28, %v3313_v27  ;;  %v3379_v36 = vld [vmem:[#allocation10 + $0xd8] sm:$0xf0]  ;;  %v3353_v27 = vld [vmem:[#allocation10 + $0xa0] sm:$0xf] }
 0x141   : > { %1872 = vmatpush.bf16.msra.mxu3 %v3226_v40  ;;  %1900 = vmatpush.bf16.msrb.mxu2 %v3230_v44  ;;  %v3318_v39 = vor.u32 %v3708_v32, %v3315_v34  ;;  %v3718_v34 = vld [vmem:[#allocation10 + $0xa4] sm:$0xf] }
 0x142   : > { %1858 = vmatpush.bf16.msra.mxu1 %v3162_v35  ;;  %1887 = vmatpush.bf16.msrb.mxu0 %v3158_v57  ;;  %v3724_v35 = vld [vmem:[#allocation10 + $0xd4] sm:$0xf] }
 0x143   : > { %v3382_v40 = vor.u32 %v3724_v35, %v3379_v36  ;;  %v3355_v35 = vld [vmem:[#allocation10 + $0xa8] sm:$0xf0] }
 0x144   : > { %v3358_v36 = vor.u32 %v3718_v34, %v3355_v35  ;;  %v1687_v35 = vld [vmem:[%s4387_s6] sm:$0x3] }
 0x145   : > { %1873 = vmatpush.bf16.msra.mxu3 %v3218_v56  ;;  %1901 = vmatpush.bf16.msrb.mxu2 %v3222_v60 }
 0x146   : > { %1859 = vmatpush.bf16.msra.mxu1 %v3154_v51  ;;  %1888 = vmatpush.bf16.msrb.mxu0 %v3150_v8 }
 0x149   : > { %1874 = vmatpush.bf16.msra.mxu3 %v3210_v7  ;;  %1902 = vmatpush.bf16.msrb.mxu2 %v3214_v11  ;;  %v3306_v11 = vor.u32 %v3707_v10, %v3305_v9  ;;  %v3761_v9 = vld [vmem:[#allocation11 + $0xf4] sm:$0xf0]  ;;  %v3744_v10 = vld [vmem:[#allocation11 + $0x74] sm:$0xf] }
 0x14a   : > { %1860 = vmatpush.bf16.msra.mxu1 %v3146_v2  ;;  %2141 = vmatpush.bf16.msra.mxu0 %v3334_v38  ;;  %v3374_v38 = vor.u32 %v3722_v17, %v3371_v18  ;;  %v3743_v18 = vld [vmem:[#allocation11 + $0x64] sm:$0xf0] }
 0x14d   : > { %2127 = vmatpush.bf16.msrb.mxu3 %v3394_v55  ;;  %2155 = vmatpush.bf16.msra.mxu2 %v3398_v45  ;;  %v3310_v55 = vor.u32 %v3706_v14, %v3307_v16  ;;  %v3298_v45 = vor.u32 %v3705_v0, %v3297_v5  ;;  %v3760_v14 = vld [vmem:[#allocation11 + $0xf4] sm:$0xf]  ;;  %v3449_v16 = vld [vmem:[#allocation11 + $0x60] sm:$0xf] }
 0x14e   : > { %2113 = vmatpush.bf16.msrb.mxu1 %v3330_v15  ;;  %2142 = vmatpush.bf16.msra.mxu0 %v3326_v47  ;;  %v3370_v15 = vor.u32 %v3723_v13, %v3369_v12  ;;  %v3289_v47 = vld [vmem:[#allocation10 + $0x20] sm:$0xf]  ;;  %v3450_v5 = vor.u32 %v3743_v18, %v3449_v16  ;;  %v3489_v16 = vld [vmem:[#allocation11 + $0xb0] sm:$0xf]  ;;  %v3753_v18 = vld [vmem:[#allocation11 + $0xb4] sm:$0xf0] }
 0x14f   : > { %v3290_v28 = vor.u32 %v3703_v26, %v3289_v47  ;;  %v3740_v47 = vld [vmem:[#allocation11 + $0x54] sm:$0xf] }
 0x151   : > { %2128 = vmatpush.bf16.msrb.mxu3 %v3386_v22  ;;  %2156 = vmatpush.bf16.msra.mxu2 %v3390_v29  ;;  %v3302_v22 = vor.u32 %v3704_v49, %v3299_v20  ;;  %v3719_v29 = vld [vmem:[#allocation10 + $0xa4] sm:$0xf0]  ;;  %v3515_v20 = vld [vmem:[#allocation11 + $0xe8] sm:$0xf0] }
 0x152   : > { %2114 = vmatpush.bf16.msrb.mxu1 %v3322_v21  ;;  %2143 = vmatpush.bf16.msra.mxu0 %v3318_v39  ;;  %v3362_v21 = vor.u32 %v3721_v61, %v3361_v19  ;;  %v3354_v32 = vor.u32 %v3719_v29, %v3353_v27  ;;  %v3701_v39 = vld [vmem:[#allocation10 + $0x14] sm:$0xf0]  ;;  %v3742_v19 = vld [vmem:[#allocation11 + $0x64] sm:$0xf]  ;;  %v3443_v27 = vld [vmem:[#allocation11 + $0x58] sm:$0xf0] }
 0x153   : > { %v3758_v61 = vld [vmem:[#allocation11 + $0xe4] sm:$0xf]  ;;  %v3507_v29 = vld [vmem:[#allocation11 + $0xd8] sm:$0xf0] }
 0x154   : > { %v3518_v23 = vor.u32 %v3758_v61, %v3515_v20  ;;  %v3735_v20 = vld [vmem:[#allocation11 + $0x24] sm:$0xf0] }
 0x155   : > { %2129 = vmatpush.bf16.msrb.mxu3 %v3378_v37  ;;  %2157 = vmatpush.bf16.msra.mxu2 %v3382_v40  ;;  %v3281_v37 = vld [vmem:[#allocation10 + $0x10] sm:$0xf] }
 0x156   : > { %2115 = vmatpush.bf16.msrb.mxu1 %v3314_v33  ;;  %2144 = vmatpush.bf16.msra.mxu0 %v3310_v55  ;;  %v3294_v33 = vor.u32 %v3702_v30, %v3291_v31  ;;  %v3345_v40 = vld [vmem:[#allocation10 + $0x90] sm:$0xf]  ;;  %v3513_v55 = vld [vmem:[#allocation11 + $0xe0] sm:$0xf]  ;;  %v3446_v31 = vor.u32 %v3740_v47, %v3443_v27  ;;  %v3750_v27 = vld [vmem:[#allocation11 + $0xa4] sm:$0xf] }
 0x159   : > { %2130 = vmatpush.bf16.msrb.mxu3 %v3370_v15  ;;  %2158 = vmatpush.bf16.msra.mxu2 %v3374_v38  ;;  %v3523_v15 = vld [vmem:[#allocation11 + $0xf8] sm:$0xf0]  ;;  %v3759_v38 = vld [vmem:[#allocation11 + $0xe4] sm:$0xf0] }
 0x15a   : > { %2116 = vmatpush.bf16.msrb.mxu1 %v3306_v11  ;;  %2145 = vmatpush.bf16.msra.mxu0 %v3302_v22  ;;  %v3459_v11 = vld [vmem:[#allocation11 + $0x78] sm:$0xf0]  ;;  %v3526_v17 = vor.u32 %v3760_v14, %v3523_v15  ;;  %v3514_v0 = vor.u32 %v3759_v38, %v3513_v55  ;;  %v3741_v22 = vld [vmem:[#allocation11 + $0x54] sm:$0xf0]  ;;  %v3425_v14 = vld [vmem:[#allocation11 + $0x30] sm:$0xf] }
 0x15b   : > { %v3462_v13 = vor.u32 %v3744_v10, %v3459_v11  ;;  %v3754_v10 = vld [vmem:[#allocation11 + $0xc4] sm:$0xf]  ;;  %v3499_v11 = vld [vmem:[#allocation11 + $0xc8] sm:$0xf0]  ;;  %v3737_v15 = vld [vmem:[#allocation11 + $0x34] sm:$0xf0] }
 0x15c   : > { %v3736_v55 = vld [vmem:[#allocation11 + $0x34] sm:$0xf]  ;;  %v3427_v38 = vld [vmem:[#allocation11 + $0x38] sm:$0xf0] }
 0x15d   : > { %2131 = vmatpush.bf16.msrb.mxu3 %v3362_v21  ;;  %2159 = vmatpush.bf16.msra.mxu2 %v3366_v25  ;;  %v3441_v21 = vld [vmem:[#allocation11 + $0x50] sm:$0xf]  ;;  %v3757_v25 = vld [vmem:[#allocation11 + $0xd4] sm:$0xf0] }
 0x15e   : > { %2117 = vmatpush.bf16.msrb.mxu1 %v3298_v45  ;;  %2146 = vmatpush.bf16.msra.mxu0 %v3294_v33  ;;  %v3451_v45 = vld [vmem:[#allocation11 + $0x68] sm:$0xf0]  ;;  %v3442_v26 = vor.u32 %v3741_v22, %v3441_v21  ;;  %v3506_v30 = vor.u32 %v3757_v25, %v3505_v24  ;;  %v3481_v21 = vld [vmem:[#allocation11 + $0xa0] sm:$0xf]  ;;  %v3734_v24 = vld [vmem:[#allocation11 + $0x24] sm:$0xf] }
 0x15f   : > { %v3454_v49 = vor.u32 %v3742_v19, %v3451_v45  ;;  %v3752_v19 = vld [vmem:[#allocation11 + $0xb4] sm:$0xf]  ;;  %v3491_v45 = vld [vmem:[#allocation11 + $0xb8] sm:$0xf0]  ;;  %v3419_v25 = vld [vmem:[#allocation11 + $0x28] sm:$0xf0] }
 0x160   : > { %v3494_v61 = vor.u32 %v3752_v19, %v3491_v45  ;;  %v2207_v19 = vld [vmem:[%s4391_s10] sm:$0x3] }
 0x161   : > { %2132 = vmatpush.bf16.msrb.mxu3 %v3354_v32  ;;  %2160 = vmatpush.bf16.msra.mxu2 %v3358_v36 }
 0x162   : > { %2118 = vmatpush.bf16.msrb.mxu1 %v3290_v28  ;;  %v3756_v28 = vld [vmem:[#allocation11 + $0xd4] sm:$0xf] }
 0x163   : > { %v3510_v32 = vor.u32 %v3756_v28, %v3507_v29  ;;  %v3483_v28 = vld [vmem:[#allocation11 + $0xa8] sm:$0xf0] }
 0x164   : > { %v3486_v29 = vor.u32 %v3750_v27, %v3483_v28 }
 0x192   : > { %v1602_v41 = vpop.f32.mrf.mxu1  ;;  %v1630_v42 = vpop.f32.mrf.mxu0 }
 0x193   : > { %v1603_v53 = vadd.f32 %v1602_v41, %v1429_v48  ;;  %v1631_v54 = vadd.f32 %v1630_v42, %v1430_v50  ;;  %v3282_v41 = vor.u32 %v3701_v39, %v3281_v37  ;;  %v3717_v42 = vld [vmem:[#allocation10 + $0x94] sm:$0xf0]  ;;  %v1689_v37 = vperm.slane %v1687_v35, 0 }
 0x195   : > { %2119 = vmatpush.bf16.msrb.mxu1 %v3282_v41 }
 0x19a   : > { %v1604_v51 = vpop.f32.mrf.mxu1  ;;  %v1632_v52 = vpop.f32.mrf.mxu0 }
 0x19b   : > { %v1605_v56 = vadd.f32 %v1604_v51, %v1429_v48  ;;  %v1633_v57 = vadd.f32 %v1632_v52, %v1430_v50  ;;  %v3716_v50 = vld [vmem:[#allocation10 + $0x94] sm:$0xf]  ;;  %v3347_v51 = vld [vmem:[#allocation10 + $0x98] sm:$0xf0] }
 0x19c   : > { %v3350_v52 = vor.u32 %v3716_v50, %v3347_v51 }
 0x19e   : > { %2161 = vmatpush.bf16.msra.mxu2 %v3350_v52 }
 0x1c3   : > { %v1616_v44 = vpop.f32.mrf.mxu3  ;;  %v1644_v46 = vpop.f32.mrf.mxu2 }
 0x1c4   : > { %v1617_v58 = vadd.f32 %v1616_v44, %v1603_v53  ;;  %v1645_v59 = vadd.f32 %v1644_v46, %v1631_v54  ;;  %v3283_v44 = vld [vmem:[#allocation10 + $0x18] sm:$0xf0]  ;;  %v3346_v46 = vor.u32 %v3717_v42, %v3345_v40  ;;  %v3273_v53 = vld [vmem:[#allocation10] sm:$0xf]  ;;  %v3699_v54 = vld [vmem:[#allocation10 + $0x4] sm:$0xf0] }
 0x1c5   : > { %v3286_v48 = vor.u32 %v3700_v43, %v3283_v44  ;;  %v1690_v40 = vperm.slane %v1687_v35, 1  ;;  %v3732_v35 = vld [vmem:[#allocation11 + $0x14] sm:$0xf] }
 0x1c6   : > { %v1649_v2 = vmax.f32 %v1617_v58, 0.0  ;;  %v1650_v3 = vmax.f32 %v1645_v59, 0.0  ;;  %2133 = vmatpush.bf16.msrb.mxu3 %v3346_v46  ;;  %v3715_v58 = vld [vmem:[#allocation10 + $0x84] sm:$0xf0]  ;;  %v3698_v59 = vld [vmem:[#allocation10 + $0x4] sm:$0xf] }
 0x1c7   : > { %2147 = vmatpush.bf16.msra.mxu0 %v3286_v48 }
 0x1cb   : > { %v1618_v60 = vpop.f32.mrf.mxu3  ;;  %v1646_v62 = vpop.f32.mrf.mxu2 }
 0x1cc   : > { %v1619_v63 = vadd.f32 %v1618_v60, %v1605_v56  ;;  %v1647_v1 = vadd.f32 %v1646_v62, %v1633_v57  ;;  %v3337_v56 = vld [vmem:[#allocation10 + $0x80] sm:$0xf]  ;;  %v3274_v57 = vor.u32 %v3699_v54, %v3273_v53  ;;  %v3275_v60 = vld [vmem:[#allocation10 + $0x8] sm:$0xf0] }
 0x1cd   : > { %v3338_v62 = vor.u32 %v3715_v58, %v3337_v56 }
 0x1ce   : > { %v1651_v4 = vmax.f32 %v1619_v63, 0.0  ;;  %v1652_v6 = vmax.f32 %v1647_v1, 0.0  ;;  %v3278_v63 = vor.u32 %v3698_v59, %v3275_v60  ;;  %v3714_v1 = vld [vmem:[#allocation10 + $0x84] sm:$0xf]  ;;  %2120 = vmatpush.bf16.msrb.mxu1 %v3274_v57 }
 0x1cf   : > { %2134 = vmatpush.bf16.msrb.mxu3 %v3338_v62 }
 0x1d0   : > { %v1653_v7 = vpack.c.bf16 %v1651_v4, %v1649_v2  ;;  %v1654_v8 = vpack.c.bf16 %v1652_v6, %v1650_v3  ;;  %v3339_v2 = vld [vmem:[#allocation10 + $0x88] sm:$0xf0]  ;;  %2148 = vmatpush.bf16.msra.mxu0 %v3278_v63  ;;  %v3457_v4 = vld [vmem:[#allocation11 + $0x70] sm:$0xf]  ;;  %v3745_v6 = vld [vmem:[#allocation11 + $0x74] sm:$0xf0] }
 0x1d1   : > { %v3342_v3 = vor.u32 %v3714_v1, %v3339_v2  ;;  %v3433_v1 = vld [vmem:[#allocation11 + $0x40] sm:$0xf]  ;;  %v3739_v2 = vld [vmem:[#allocation11 + $0x44] sm:$0xf0] }
 0x1d2   : > { %1861 = vmatmul.bf16.vlgmr.msra.gmra.mxu1 %v1653_v7  ;;  %1875 = vmatmul.bf16.vlgmr.msra.gmra.mxu3 %v1654_v8 }
 0x1d3   : > { %1889 = vmatmul.bf16.vlgmr.msrb.gmra.mxu0 %v1653_v7  ;;  %1903 = vmatmul.bf16.vlgmr.msrb.gmra.mxu2 %v1654_v8  ;;  %v3521_v7 = vld [vmem:[#allocation11 + $0xf0] sm:$0xf]  ;;  %v3458_v8 = vor.u32 %v3745_v6, %v3457_v4  ;;  %v3497_v4 = vld [vmem:[#allocation11 + $0xc0] sm:$0xf]  ;;  %v3755_v6 = vld [vmem:[#allocation11 + $0xc4] sm:$0xf0] }
 0x1d4   : > { %2162 = vmatpush.bf16.msra.mxu2 %v3342_v3  ;;  %v3522_v12 = vor.u32 %v3761_v9, %v3521_v7  ;;  %2401 = vmatpush.bf16.msrb.mxu0 %v3462_v13  ;;  %v3434_v3 = vor.u32 %v3739_v2, %v3433_v1  ;;  %v3738_v7 = vld [vmem:[#allocation11 + $0x44] sm:$0xf]  ;;  %v3435_v9 = vld [vmem:[#allocation11 + $0x48] sm:$0xf0]  ;;  %v3502_v13 = vor.u32 %v3754_v10, %v3499_v11 }
 0x1d5   : > { %2373 = vmatpush.bf16.msra.mxu1 %v3458_v8  ;;  %v3498_v8 = vor.u32 %v3755_v6, %v3497_v4 }
 0x1d6   : > { %2387 = vmatpush.bf16.msra.mxu3 %v3522_v12  ;;  %v3438_v12 = vor.u32 %v3738_v7, %v3435_v9 }
 0x1d8   : > { %2415 = vmatpush.bf16.msrb.mxu2 %v3526_v17  ;;  %2402 = vmatpush.bf16.msrb.mxu0 %v3454_v49  ;;  %v3426_v17 = vor.u32 %v3737_v15, %v3425_v14  ;;  %v3417_v49 = vld [vmem:[#allocation11 + $0x20] sm:$0xf] }
 0x1d9   : > { %2374 = vmatpush.bf16.msra.mxu1 %v3450_v5  ;;  %v3490_v5 = vor.u32 %v3753_v18, %v3489_v16  ;;  %v3418_v22 = vor.u32 %v3735_v20, %v3417_v49  ;;  %v2210_v20 = vperm.slane %v2207_v19, 1 }
 0x1da   : > { %2388 = vmatpush.bf16.msra.mxu3 %v3514_v0  ;;  %v3430_v0 = vor.u32 %v3736_v55, %v3427_v38 }
 0x1dc   : > { %2416 = vmatpush.bf16.msrb.mxu2 %v3518_v23  ;;  %2403 = vmatpush.bf16.msrb.mxu0 %v3446_v31  ;;  %v3751_v23 = vld [vmem:[#allocation11 + $0xa4] sm:$0xf0]  ;;  %v3733_v31 = vld [vmem:[#allocation11 + $0x14] sm:$0xf0] }
 0x1dd   : > { %2375 = vmatpush.bf16.msra.mxu1 %v3442_v26  ;;  %v3482_v47 = vor.u32 %v3751_v23, %v3481_v21  ;;  %v3422_v26 = vor.u32 %v3734_v24, %v3419_v25  ;;  %v2433_v21 = vld [vmem:[%s4392_s11] sm:$0x3] }
 0x1de   : > { %2389 = vmatpush.bf16.msra.mxu3 %v3506_v30  ;;  %v3409_v30 = vld [vmem:[#allocation11 + $0x10] sm:$0xf]  ;;  %v2436_v28 = vperm.slane %v2433_v21, 1 }
 0x1e0   : > { %2417 = vmatpush.bf16.msrb.mxu2 %v3510_v32  ;;  %2404 = vmatpush.bf16.msrb.mxu0 %v3438_v12  ;;  %v3473_v32 = vld [vmem:[#allocation11 + $0x90] sm:$0xf] }
 0x1e1   : > { %2376 = vmatpush.bf16.msra.mxu1 %v3434_v3 }
 0x1e2   : > { %2390 = vmatpush.bf16.msra.mxu3 %v3498_v8 }
 0x1e4   : > { %2418 = vmatpush.bf16.msrb.mxu2 %v3502_v13  ;;  %2405 = vmatpush.bf16.msrb.mxu0 %v3430_v0 }
 0x1e5   : > { %2377 = vmatpush.bf16.msra.mxu1 %v3426_v17 }
 0x1e6   : > { %2391 = vmatpush.bf16.msra.mxu3 %v3490_v5 }
 0x1e8   : > { %2419 = vmatpush.bf16.msrb.mxu2 %v3494_v61  ;;  %2406 = vmatpush.bf16.msrb.mxu0 %v3422_v26  ;;  %v2209_v61 = vperm.slane %v2207_v19, 0  ;;  %v2435_v26 = vperm.slane %v2433_v21, 0 }
 0x1e9   : > { %2378 = vmatpush.bf16.msra.mxu1 %v3418_v22 }
 0x1ea   : > { %2392 = vmatpush.bf16.msra.mxu3 %v3482_v47 }
 0x1ec   : > { %2420 = vmatpush.bf16.msrb.mxu2 %v3486_v29 }
 0x24f   : > { %v1862_v33 = vpop.f32.mrf.mxu1 }
 0x250   : > { %v1890_v34 = vpop.f32.mrf.mxu0  ;;  %v1863_v42 = vadd.f32 %v1862_v33, %v1689_v37  ;;  %v3410_v33 = vor.u32 %v3733_v31, %v3409_v30 }
 0x251   : > { %v1891_v44 = vadd.f32 %v1890_v34, %v1690_v40  ;;  %v3749_v34 = vld [vmem:[#allocation11 + $0x94] sm:$0xf0] }
 0x252   : > { %2379 = vmatpush.bf16.msra.mxu1 %v3410_v33 }
 0x255   : > { %v1876_v36 = vpop.f32.mrf.mxu3 }
 0x256   : > { %v1904_v39 = vpop.f32.mrf.mxu2  ;;  %v1877_v46 = vadd.f32 %v1876_v36, %v1863_v42  ;;  %v3411_v36 = vld [vmem:[#allocation11 + $0x18] sm:$0xf0] }
 0x257   : > { %v1864_v41 = vpop.f32.mrf.mxu1  ;;  %v1905_v50 = vadd.f32 %v1904_v39, %v1891_v44  ;;  %v3414_v39 = vor.u32 %v3732_v35, %v3411_v36  ;;  %v3731_v44 = vld [vmem:[#allocation11 + $0x4] sm:$0xf0] }
 0x258   : > { %v1892_v43 = vpop.f32.mrf.mxu0  ;;  %v1865_v48 = vadd.f32 %v1864_v41, %v1689_v37  ;;  %v1909_v57 = vmax.f32 %v1877_v46, 0.0  ;;  %v3474_v37 = vor.u32 %v3749_v34, %v3473_v32  ;;  %v3475_v41 = vld [vmem:[#allocation11 + $0x98] sm:$0xf0]  ;;  %v3465_v46 = vld [vmem:[#allocation11 + $0x80] sm:$0xf] }
 0x259   : > { %v1893_v51 = vadd.f32 %v1892_v43, %v1690_v40  ;;  %v1910_v59 = vmax.f32 %v1905_v50, 0.0  ;;  %v3748_v40 = vld [vmem:[#allocation11 + $0x94] sm:$0xf]  ;;  %v3401_v43 = vld [vmem:[#allocation11] sm:$0xf]  ;;  %2407 = vmatpush.bf16.msrb.mxu0 %v3414_v39 }
 0x25a   : > { %v3478_v42 = vor.u32 %v3748_v40, %v3475_v41  ;;  %2393 = vmatpush.bf16.msra.mxu3 %v3474_v37  ;;  %v3747_v50 = vld [vmem:[#allocation11 + $0x84] sm:$0xf0] }
 0x25c   : > { %2421 = vmatpush.bf16.msrb.mxu2 %v3478_v42 }
 0x25d   : > { %v1878_v52 = vpop.f32.mrf.mxu3 }
 0x25e   : > { %v1879_v53 = vadd.f32 %v1878_v52, %v1865_v48  ;;  %v1906_v54 = vpop.f32.mrf.mxu2  ;;  %v3402_v48 = vor.u32 %v3731_v44, %v3401_v43  ;;  %v3403_v52 = vld [vmem:[#allocation11 + $0x8] sm:$0xf0] }
 0x25f   : > { %v1907_v56 = vadd.f32 %v1906_v54, %v1893_v51  ;;  %v3730_v51 = vld [vmem:[#allocation11 + $0x4] sm:$0xf] }
 0x260   : > { %v1911_v58 = vmax.f32 %v1879_v53, 0.0  ;;  %v3466_v53 = vor.u32 %v3747_v50, %v3465_v46  ;;  %v3406_v54 = vor.u32 %v3730_v51, %v3403_v52  ;;  %2380 = vmatpush.bf16.msra.mxu1 %v3402_v48  ;;  %v3859_v51 = vld [vmem:[#allocation2] ss:$0 sm:$0xff] }
 0x261   : > { %v1912_v60 = vmax.f32 %v1907_v56, 0.0  ;;  %v3746_v56 = vld [vmem:[#allocation11 + $0x84] sm:$0xf] }
 0x262   : > { %v1913_v62 = vpack.c.bf16 %v1911_v58, %v1909_v57  ;;  %v3467_v57 = vld [vmem:[#allocation11 + $0x88] sm:$0xf0]  ;;  %2394 = vmatpush.bf16.msra.mxu3 %v3466_v53  ;;  %2408 = vmatpush.bf16.msrb.mxu0 %v3406_v54 }
 0x263   : > { %v1914_v63 = vpack.c.bf16 %v1912_v60, %v1910_v59  ;;  %v3470_v58 = vor.u32 %v3746_v56, %v3467_v57 }
 0x264   : > { %2121 = vmatmul.bf16.vlgmr.msrb.gmra.mxu1 %v1913_v62  ;;  %2149 = vmatmul.bf16.vlgmr.msra.gmra.mxu0 %v1913_v62  ;;  %v1947_v62 = vld [vmem:[%s4389_s8] sm:$0x3] }
 0x265   : > { %2135 = vmatmul.bf16.vlgmr.msrb.gmra.mxu3 %v1914_v63  ;;  %2163 = vmatmul.bf16.vlgmr.msra.gmra.mxu2 %v1914_v63  ;;  %v1949_v2 = vperm.slane %v1947_v62, 0  ;;  %v1950_v3 = vperm.slane %v1947_v62, 1 }
 0x266   : > { %2422 = vmatpush.bf16.msrb.mxu2 %v3470_v58 }
 0x2e1   : > { %v2122_v59 = vpop.f32.mrf.mxu1  ;;  %v2150_v60 = vpop.f32.mrf.mxu0 }
 0x2e2   : > { %v2123_v7 = vadd.f32 %v2122_v59, %v1949_v2  ;;  %v2151_v8 = vadd.f32 %v2150_v60, %v1950_v3 }
 0x2e8   : > { %v2136_v63 = vpop.f32.mrf.mxu3  ;;  %v2164_v1 = vpop.f32.mrf.mxu2 }
 0x2e9   : > { %v2124_v4 = vpop.f32.mrf.mxu1  ;;  %v2152_v6 = vpop.f32.mrf.mxu0  ;;  %v2137_v9 = vadd.f32 %v2136_v63, %v2123_v7  ;;  %v2165_v10 = vadd.f32 %v2164_v1, %v2151_v8 }
 0x2ea   : > { %v2125_v11 = vadd.f32 %v2124_v4, %v1949_v2  ;;  %v2153_v12 = vadd.f32 %v2152_v6, %v1950_v3 }
 0x2eb   : > { %v2169_v17 = vmax.f32 %v2137_v9, 0.0  ;;  %v2170_v18 = vmax.f32 %v2165_v10, 0.0 }
 0x2f0   : > { %v2138_v13 = vpop.f32.mrf.mxu3  ;;  %v2166_v14 = vpop.f32.mrf.mxu2 }
 0x2f1   : > { %v2139_v15 = vadd.f32 %v2138_v13, %v2125_v11  ;;  %v2167_v16 = vadd.f32 %v2166_v14, %v2153_v12 }
 0x2f3   : > { %v2171_v55 = vmax.f32 %v2139_v15, 0.0  ;;  %v2172_v38 = vmax.f32 %v2167_v16, 0.0 }
 0x2f5   : > { %v2173_v5 = vpack.c.bf16 %v2171_v55, %v2169_v17  ;;  %v2174_v0 = vpack.c.bf16 %v2172_v38, %v2170_v18 }
 0x2f7   : > { %2381 = vmatmul.bf16.vlgmr.msra.gmra.mxu1 %v2173_v5  ;;  %2395 = vmatmul.bf16.vlgmr.msra.gmra.mxu3 %v2174_v0 }
 0x2f8   : > { %2409 = vmatmul.bf16.vlgmr.msrb.gmra.mxu0 %v2173_v5  ;;  %2423 = vmatmul.bf16.vlgmr.msrb.gmra.mxu2 %v2174_v0 }
 0x374   : > { %v2382_v45 = vpop.f32.mrf.mxu1 }
 0x375   : > { %v2410_v49 = vpop.f32.mrf.mxu0  ;;  %v2383_v22 = vadd.f32 %v2382_v45, %v2209_v61 }
 0x376   : > { %v2411_v23 = vadd.f32 %v2410_v49, %v2210_v20 }
 0x37a   : > { %v2396_v24 = vpop.f32.mrf.mxu3 }
 0x37b   : > { %v2397_v25 = vadd.f32 %v2396_v24, %v2383_v22  ;;  %v2424_v47 = vpop.f32.mrf.mxu2 }
 0x37c   : > { %v2425_v27 = vadd.f32 %v2424_v47, %v2411_v23  ;;  %v2384_v31 = vpop.f32.mrf.mxu1 }
 0x37d   : > { %v2429_v29 = vmax.f32 %v2397_v25, 0.0  ;;  %v2412_v32 = vpop.f32.mrf.mxu0  ;;  %v2385_v35 = vadd.f32 %v2384_v31, %v2209_v61 }
 0x37e   : > { %v2430_v30 = vmax.f32 %v2425_v27, 0.0  ;;  %v2413_v36 = vadd.f32 %v2412_v32, %v2210_v20 }
 0x37f   : > { %v2439_v33 = vmul.f32 %v2435_v26, %v2429_v29 }
 0x380   : > { %v2440_v34 = vmul.f32 %v2436_v28, %v2430_v30 }
 0x382   : > { %v2398_v37 = vpop.f32.mrf.mxu3  ;;  %v2443_v39 = vadd.f32 %v2440_v34, %v2439_v33 }
 0x383   : > { %v2399_v40 = vadd.f32 %v2398_v37, %v2385_v35  ;;  %v2426_v41 = vpop.f32.mrf.mxu2 }
 0x384   : > { %v2427_v42 = vadd.f32 %v2426_v41, %v2413_v36  ;;  %2444 = vadd.xlane.f32.xlu0 %v2443_v39 }
 0x385   : > { %v2431_v43 = vmax.f32 %v2399_v40, 0.0 }
 0x386   : > { %v2432_v44 = vmax.f32 %v2427_v42, 0.0 }
 0x387   : > { %v2441_v46 = vmul.f32 %v2435_v26, %v2431_v43 }
 0x388   : > { %v2442_v48 = vmul.f32 %v2436_v28, %v2432_v44 }
 0x38a   : > { %v2446_v50 = vadd.f32 %v2442_v48, %v2441_v46 }
 0x38c   : > { %2447 = vadd.xlane.f32.xlu0 %v2446_v50 }
 0x3f7   : > { %v2445_v52 = vpop.xlane.xlu0 %2444 }
 0x3f8   : > { %v2453_v53 = vadd.f32 %v3859_v51, %v2445_v52 }
 0x3fa   : > { %2456 = vst.msk [vmem:[%s549_s17] sm:$0xff] %vm2455_vm1, %v2453_v53 }
 0x3ff   : > { %v2448_v54 = vpop.xlane.xlu0 %2447 }
 0x400   : > { %v2454_v56 = vadd.f32 %v3859_v51, %v2448_v54 }
 0x402   : > { %2457 = vst.msk [vmem:[%s549_s17 + $0x8] sm:$0xff] %vm2455_vm1, %v2454_v56 }
 0x403 PF: > { %p28_p3 = scmp.ge.s32.totalorder %s4237_s12, 4   ;;  %s4412_s27 = smov %s4078_s28 }
 0x404   : > { %s4413_s28 = smov %s4082_s29  ;;  %s4414_s29 = smov %s4248_s25 }
 0x405   : > { %s4415_s30 = smov %s4237_s12  ;;  %30 = sbr.rel (!%p28_p3) target bundleno = 12 (0xc), region = 132 }
 0x40a   :  { %2480 = vsyncpa [#allocation4], 1 }
 0x40b   :  { %2482 = vsyncpa [#allocation4 + $0x1], 1 }
 0x40c   :  { %2483 = vsyncpa [#allocation6], 1 }
 0x40d   :  { %2484 = vsyncpa [#allocation9], 1 }
 0x40e   :  { %2485 = vsyncpa [#allocation12], 1 }

</bundles_post_ra>
